<compile_context>
chip_gen: v5e
topology: v5e:2x2
jax: 0.10.0
libtpu: 0.0.40
codegen_flags: <defaults>
</compile_context>

<pallas_src>
import functools
import math

import jax
import jax.numpy as jnp
from jax.experimental import pallas as pl
from jax.experimental.pallas import tpu as pltpu


def _round_up(n, m):
    return ((n + m - 1) // m) * m


def _act_dtype():
    """bf16 Mish on chips with a bf16 VPU/EUP (v6e, v7x); f32 elsewhere (v5e...)."""
    try:
        kind = jax.devices()[0].device_kind.lower()
    except Exception:
        return jnp.float32
    if ("v6" in kind) or ("v7" in kind) or ("7x" in kind):
        return jnp.bfloat16
    return jnp.float32


def _choose_block_b(b_pad, block_b_max):
    """Largest multiple-of-128 divisor of b_pad that is <= block_b_max.

    When b_pad allows it, guarantee >= 2 grid steps so the 'parallel' batch
    axis actually shards across both TensorCores on v7x."""
    n = b_pad // 128
    divisors = [d for d in range(1, n + 1) if n % d == 0]
    cand = [d for d in divisors if 128 * d <= block_b_max]
    best = max(cand) if cand else 1
    if n >= 2 and best == n:
        best = max(d for d in divisors if d < n)
    return 128 * best


def mlp_kernel(xin_ref, w1_ref, b1_ref, w2_ref, b2_ref, w3_ref, b3_ref,
               wf_ref, bf_ref, out_ref, *, act_dtype):
    f32 = jnp.float32
    bf16 = jnp.bfloat16

    def mish(v_f32):
        # mish(v) = v * tanh(softplus(v)) = v * u*(u+2) / (u*(u+2) + 2), u=exp(v)
        # Clamp so exp never overflows; for v >= 20 mish(v) == v to precision.
        v = v_f32.astype(act_dtype)
        u = jnp.exp(jnp.minimum(v, 20.0))
        n = u * (u + 2.0)
        if act_dtype == jnp.float32:
            t = n * pl.reciprocal(n + 2.0, approx=True)   # EUP vrcp (free slot)
        else:
            t = n / (n + 2.0)                             # bf16 VPU/EUP path
        return (v * t).astype(bf16)                       # ready for next MXU pass

    # mid_layer[0]: fused Linear(input_dim -> 256) on the padded concat.
    h = jnp.dot(xin_ref[...], w1_ref[...], preferred_element_type=f32) + b1_ref[...]
    h = mish(h)
    # mid_layer[1]: Linear(256 -> 256) + Mish
    h = jnp.dot(h, w2_ref[...], preferred_element_type=f32) + b2_ref[...]
    h = mish(h)
    # mid_layer[2]: Linear(256 -> 256) + Mish
    h = jnp.dot(h, w3_ref[...], preferred_element_type=f32) + b3_ref[...]
    h = mish(h)
    # final_layer: Linear(256 -> action_dim), output padded to 128 lanes (bf16).
    out_ref[...] = (
        jnp.dot(h, wf_ref[...], preferred_element_type=f32) + bf_ref[...]
    ).astype(out_ref.dtype)


def sinusoidal_pos_emb(time, dim):
    # Matches the standard SinusoidalPosEmb used with this MLP.
    half_dim = dim // 2
    scale = math.log(10000.0) / (half_dim - 1)
    freqs = jnp.exp(jnp.arange(half_dim, dtype=jnp.float32) * -scale)
    arg = time.astype(jnp.float32)[:, None] * freqs[None, :]
    return jnp.concatenate([jnp.sin(arg), jnp.cos(arg)], axis=-1)


def init_params(key, state_dim, action_dim, t_dim=16):
    """Deterministic PyTorch-style Linear init: U(-1/sqrt(fan_in), 1/sqrt(fan_in))."""
    def linear(key, fan_in, fan_out):
        kw, kb = jax.random.split(key)
        bound = 1.0 / math.sqrt(fan_in)
        w = jax.random.uniform(kw, (fan_in, fan_out), jnp.float32, -bound, bound)
        b = jax.random.uniform(kb, (1, fan_out), jnp.float32, -bound, bound)
        return w, b

    keys = jax.random.split(key, 6)
    input_dim = state_dim + action_dim + t_dim
    p = {}
    p["tw1"], p["tb1"] = linear(keys[0], t_dim, t_dim * 2)
    p["tw2"], p["tb2"] = linear(keys[1], t_dim * 2, t_dim)
    p["wm1"], p["bm1"] = linear(keys[2], input_dim, 256)
    p["wm2"], p["bm2"] = linear(keys[3], 256, 256)
    p["wm3"], p["bm3"] = linear(keys[4], 256, 256)
    p["wf"], p["bf"] = linear(keys[5], 256, action_dim)
    return p


def prepack_params(params):
    """One-time conversion into the kernel's padded bf16 layout (hoisted out of
    the per-call path).  Time-mlp params stay f32 (tiny, computed in plain JAX)."""
    input_dim, hidden = params["wm1"].shape
    action_dim = params["wf"].shape[1]
    k1 = _round_up(input_dim, 128)        # lane-dense K for the fused first layer
    n_out = _round_up(action_dim, 128)    # lane-dense output width
    bf16 = jnp.bfloat16
    return {
        "tw1": params["tw1"], "tb1": params["tb1"],
        "tw2": params["tw2"], "tb2": params["tb2"],
        "w1": jnp.zeros((k1, hidden), bf16).at[:input_dim, :].set(
            params["wm1"].astype(bf16)),
        "b1": params["bm1"].astype(jnp.float32),
        "w2": params["wm2"].astype(bf16),
        "b2": params["bm2"].astype(jnp.float32),
        "w3": params["wm3"].astype(bf16),
        "b3": params["bm3"].astype(jnp.float32),
        "wf": jnp.zeros((hidden, n_out), bf16).at[:, :action_dim].set(
            params["wf"].astype(bf16)),
        "bf": jnp.zeros((1, n_out), jnp.float32).at[:, :action_dim].set(params["bf"]),
    }


def mlp_forward(packed, x, time, state, block_b_max=2048):
    # torch: if len(time.shape) > 1: time = time.squeeze(1)
    if time.ndim > 1:
        time = jnp.squeeze(time, axis=1)

    # ---- tiny glue math (sinusoidal emb + time_mlp, <0.3% of FLOPs) in JAX ----
    t_dim = packed["tw2"].shape[1]
    emb = sinusoidal_pos_emb(time, t_dim)                       # (B, t_dim)
    th = emb @ packed["tw1"] + packed["tb1"]
    th = th * jnp.tanh(jax.nn.softplus(th))                     # Mish (exact f32)
    t = th @ packed["tw2"] + packed["tb2"]                      # (B, t_dim)

    B = x.shape[0]
    action_dim = x.shape[1]
    hidden = packed["w2"].shape[0]                              # 256
    k1 = packed["w1"].shape[0]                                  # padded input_dim
    n_out = packed["wf"].shape[1]                               # padded action_dim

    # concat in the wrapper -> a single fused first-layer matmul in the kernel
    xin = jnp.concatenate([x, t, state], axis=1)                # (B, input_dim)
    input_dim = xin.shape[1]

    # ---- batch / tile geometry ----
    block_b_max = max(128, (int(block_b_max) // 128) * 128)     # validate / clamp
    b_pad = _round_up(B, 128)                                   # minimal batch pad
    block_b = _choose_block_b(b_pad, block_b_max)
    grid = (b_pad // block_b,)

    bf16 = jnp.bfloat16
    xin_p = jnp.zeros((b_pad, k1), bf16).at[:B, :input_dim].set(xin.astype(bf16))

    act_dtype = _act_dtype()

    # Weights/biases: same block index every grid step -> DMA'd once, VMEM-resident.
    def resident(shape):
        return pl.BlockSpec(shape, lambda i: (0, 0))

    in_specs = [
        pl.BlockSpec((block_b, k1), lambda i: (i, 0)),          # streamed input tile
        resident((k1, hidden)), resident((1, hidden)),
        resident((hidden, hidden)), resident((1, hidden)),
        resident((hidden, hidden)), resident((1, hidden)),
        resident((hidden, n_out)), resident((1, n_out)),
    ]
    out_spec = pl.BlockSpec((block_b, n_out), lambda i: (i, 0))

    flops = 2 * b_pad * (k1 * hidden + 2 * hidden * hidden + hidden * n_out)
    transcendentals = 2 * 3 * b_pad * hidden     # exp + reciprocal(divide) per Mish
    bytes_accessed = (
        b_pad * k1 * 2                                           # input (bf16)
        + 2 * (k1 * hidden + 2 * hidden * hidden + hidden * n_out)  # weights (bf16)
        + (3 * hidden + n_out) * 4                               # biases (f32)
        + b_pad * n_out * 2                                      # output (bf16)
    )

    out = pl.pallas_call(
        functools.partial(mlp_kernel, act_dtype=act_dtype),
        out_shape=jax.ShapeDtypeStruct((b_pad, n_out), bf16),
        grid=grid,
        in_specs=in_specs,
        out_specs=out_spec,
        compiler_params=pltpu.CompilerParams(
            dimension_semantics=("parallel",),   # megacore batch sharding on v7x
        ),
        cost_estimate=pl.CostEstimate(
            flops=flops,
            transcendentals=transcendentals,
            bytes_accessed=bytes_accessed,
        ),
    )(xin_p, packed["w1"], packed["b1"], packed["w2"], packed["b2"],
      packed["w3"], packed["b3"], packed["wf"], packed["bf"])

    # Slice off batch/lane padding, upcast to f32 to match the reference dtype.
    return out[:B, :action_dim].astype(jnp.float32)


def mlp_reference(params, x, time, state, t_dim=16):
    """Pure-JAX f32 reference (mirrors the PyTorch forward exactly)."""
    if time.ndim > 1:
        time = jnp.squeeze(time, axis=1)

    def mish(v):
        return v * jnp.tanh(jax.nn.softplus(v))

    emb = sinusoidal_pos_emb(time, t_dim)
    t = mish(emb @ params["tw1"] + params["tb1"]) @ params["tw2"] + params["tb2"]
    h = jnp.concatenate([x, t, state], axis=1)
    h = mish(h @ params["wm1"] + params["bm1"])
    h = mish(h @ params["wm2"] + params["bm2"])
    h = mish(h @ params["wm3"] + params["bm3"])
    return h @ params["wf"] + params["bf"]


if __name__ == "__main__":
    B = 2
    state_dim = 16
    action_dim = 4
    t_dim = 16

    key = jax.random.PRNGKey(0)
    k_param, k_x, k_t, k_s = jax.random.split(key, 4)

    params = init_params(k_param, state_dim, action_dim, t_dim)
    packed = prepack_params(params)                     # one-time weight packing

    x = jax.random.normal(k_x, (B, action_dim), jnp.float32)       # noisy action
    time = jax.random.uniform(k_t, (B,), jnp.float32, 0.0, 10.0)   # diffusion step
    state = jax.random.normal(k_s, (B, state_dim), jnp.float32)    # observation

    fwd = jax.jit(mlp_forward)
    out = jax.block_until_ready(fwd(packed, x, time, state))

    assert out.shape == (B, action_dim), out.shape
    assert bool(jnp.all(jnp.isfinite(out))), "non-finite output"

    # Loose tolerance: bf16 MXU matmuls, bf16/approx-reciprocal Mish, bf16 output.
    ref = mlp_reference(params, x, time, state, t_dim=t_dim)
    err = float(jnp.max(jnp.abs(out - ref)))
    assert err < 0.1, f"max abs error {err} too large"

    print("KERNEL_OK")
</pallas_src>

<mosaic_0001>
module attributes {stable_mosaic.version = 11 : i64} {
  func.func @mlp_kernel(%arg0: i32, %arg1: memref<128x128xbf16, #tpu.memory_space<vmem>>, %arg2: memref<128x256xbf16, #tpu.memory_space<vmem>>, %arg3: memref<1x256xf32, #tpu.memory_space<vmem>>, %arg4: memref<256x256xbf16, #tpu.memory_space<vmem>>, %arg5: memref<1x256xf32, #tpu.memory_space<vmem>>, %arg6: memref<256x256xbf16, #tpu.memory_space<vmem>>, %arg7: memref<1x256xf32, #tpu.memory_space<vmem>>, %arg8: memref<256x128xbf16, #tpu.memory_space<vmem>>, %arg9: memref<1x128xf32, #tpu.memory_space<vmem>>, %arg10: memref<128x128xbf16, #tpu.memory_space<vmem>>) attributes {dimension_semantics = [#tpu.dimension_semantics<parallel>], iteration_bounds = array<i64: 1>, scalar_prefetch = 0 : i64, scratch_operands = 0 : i64, tpu.core_type = #tpu.core_type<tc>, window_params = [{transform_indices = @transform_0, window_bounds = array<i64: 128, 128>}, {pipeline_mode = #tpu.pipeline_mode<synchronous>, transform_indices = @transform_1, window_bounds = array<i64: 128, 256>}, {pipeline_mode = #tpu.pipeline_mode<synchronous>, transform_indices = @transform_2, window_bounds = array<i64: 1, 256>}, {pipeline_mode = #tpu.pipeline_mode<synchronous>, transform_indices = @transform_3, window_bounds = array<i64: 256, 256>}, {pipeline_mode = #tpu.pipeline_mode<synchronous>, transform_indices = @transform_4, window_bounds = array<i64: 1, 256>}, {pipeline_mode = #tpu.pipeline_mode<synchronous>, transform_indices = @transform_5, window_bounds = array<i64: 256, 256>}, {pipeline_mode = #tpu.pipeline_mode<synchronous>, transform_indices = @transform_6, window_bounds = array<i64: 1, 256>}, {pipeline_mode = #tpu.pipeline_mode<synchronous>, transform_indices = @transform_7, window_bounds = array<i64: 256, 128>}, {pipeline_mode = #tpu.pipeline_mode<synchronous>, transform_indices = @transform_8, window_bounds = array<i64: 1, 128>}, {transform_indices = @transform_9, window_bounds = array<i64: 128, 128>}]} {
    %c0 = arith.constant 0 : index
    %c0_0 = arith.constant 0 : index
    %0 = vector.load %arg1[%c0, %c0_0] : memref<128x128xbf16, #tpu.memory_space<vmem>>, vector<128x128xbf16>
    %c0_1 = arith.constant 0 : index
    %c0_2 = arith.constant 0 : index
    %1 = vector.load %arg2[%c0_1, %c0_2] : memref<128x256xbf16, #tpu.memory_space<vmem>>, vector<128x256xbf16>
    %cst = arith.constant dense<0.000000e+00> : vector<128x256xf32>
    %2 = tpu.matmul %0, %1, %cst {dimension_numbers = #tpu.dot_dimension_numbers<[1], [0], [0], [1], [0, 0, 1, 1], [], []>} : vector<128x128xbf16>, vector<128x256xbf16>, vector<128x256xf32> -> vector<128x256xf32>
    %c0_3 = arith.constant 0 : index
    %c0_4 = arith.constant 0 : index
    %3 = vector.load %arg3[%c0_3, %c0_4] : memref<1x256xf32, #tpu.memory_space<vmem>>, vector<1x256xf32>
    %4 = vector.broadcast %3 : vector<1x256xf32> to vector<128x256xf32>
    %5 = arith.addf %2, %4 : vector<128x256xf32>
    %cst_5 = arith.constant 2.000000e+01 : f32
    %6 = vector.broadcast %cst_5 : f32 to vector<128x256xf32>
    %7 = arith.minimumf %5, %6 : vector<128x256xf32>
    %8 = math.exp %7 : vector<128x256xf32>
    %cst_6 = arith.constant 2.000000e+00 : f32
    %9 = vector.broadcast %cst_6 : f32 to vector<128x256xf32>
    %10 = arith.addf %8, %9 : vector<128x256xf32>
    %11 = arith.mulf %8, %10 : vector<128x256xf32>
    %cst_7 = arith.constant 2.000000e+00 : f32
    %12 = vector.broadcast %cst_7 : f32 to vector<128x256xf32>
    %13 = arith.addf %11, %12 : vector<128x256xf32>
    %14 = tpu.reciprocal %13 {approx = true} : vector<128x256xf32> -> vector<128x256xf32>
    %15 = arith.mulf %11, %14 : vector<128x256xf32>
    %16 = arith.mulf %5, %15 : vector<128x256xf32>
    %17 = arith.truncf %16 : vector<128x256xf32> to vector<128x256xbf16>
    %c0_8 = arith.constant 0 : index
    %c0_9 = arith.constant 0 : index
    %18 = vector.load %arg4[%c0_8, %c0_9] : memref<256x256xbf16, #tpu.memory_space<vmem>>, vector<256x256xbf16>
    %cst_10 = arith.constant dense<0.000000e+00> : vector<128x256xf32>
    %19 = tpu.matmul %17, %18, %cst_10 {dimension_numbers = #tpu.dot_dimension_numbers<[1], [0], [0], [1], [0, 0, 1, 1], [], []>} : vector<128x256xbf16>, vector<256x256xbf16>, vector<128x256xf32> -> vector<128x256xf32>
    %c0_11 = arith.constant 0 : index
    %c0_12 = arith.constant 0 : index
    %20 = vector.load %arg5[%c0_11, %c0_12] : memref<1x256xf32, #tpu.memory_space<vmem>>, vector<1x256xf32>
    %21 = vector.broadcast %20 : vector<1x256xf32> to vector<128x256xf32>
    %22 = arith.addf %19, %21 : vector<128x256xf32>
    %cst_13 = arith.constant 2.000000e+01 : f32
    %23 = vector.broadcast %cst_13 : f32 to vector<128x256xf32>
    %24 = arith.minimumf %22, %23 : vector<128x256xf32>
    %25 = math.exp %24 : vector<128x256xf32>
    %cst_14 = arith.constant 2.000000e+00 : f32
    %26 = vector.broadcast %cst_14 : f32 to vector<128x256xf32>
    %27 = arith.addf %25, %26 : vector<128x256xf32>
    %28 = arith.mulf %25, %27 : vector<128x256xf32>
    %cst_15 = arith.constant 2.000000e+00 : f32
    %29 = vector.broadcast %cst_15 : f32 to vector<128x256xf32>
    %30 = arith.addf %28, %29 : vector<128x256xf32>
    %31 = tpu.reciprocal %30 {approx = true} : vector<128x256xf32> -> vector<128x256xf32>
    %32 = arith.mulf %28, %31 : vector<128x256xf32>
    %33 = arith.mulf %22, %32 : vector<128x256xf32>
    %34 = arith.truncf %33 : vector<128x256xf32> to vector<128x256xbf16>
    %c0_16 = arith.constant 0 : index
    %c0_17 = arith.constant 0 : index
    %35 = vector.load %arg6[%c0_16, %c0_17] : memref<256x256xbf16, #tpu.memory_space<vmem>>, vector<256x256xbf16>
    %cst_18 = arith.constant dense<0.000000e+00> : vector<128x256xf32>
    %36 = tpu.matmul %34, %35, %cst_18 {dimension_numbers = #tpu.dot_dimension_numbers<[1], [0], [0], [1], [0, 0, 1, 1], [], []>} : vector<128x256xbf16>, vector<256x256xbf16>, vector<128x256xf32> -> vector<128x256xf32>
    %c0_19 = arith.constant 0 : index
    %c0_20 = arith.constant 0 : index
    %37 = vector.load %arg7[%c0_19, %c0_20] : memref<1x256xf32, #tpu.memory_space<vmem>>, vector<1x256xf32>
    %38 = vector.broadcast %37 : vector<1x256xf32> to vector<128x256xf32>
    %39 = arith.addf %36, %38 : vector<128x256xf32>
    %cst_21 = arith.constant 2.000000e+01 : f32
    %40 = vector.broadcast %cst_21 : f32 to vector<128x256xf32>
    %41 = arith.minimumf %39, %40 : vector<128x256xf32>
    %42 = math.exp %41 : vector<128x256xf32>
    %cst_22 = arith.constant 2.000000e+00 : f32
    %43 = vector.broadcast %cst_22 : f32 to vector<128x256xf32>
    %44 = arith.addf %42, %43 : vector<128x256xf32>
    %45 = arith.mulf %42, %44 : vector<128x256xf32>
    %cst_23 = arith.constant 2.000000e+00 : f32
    %46 = vector.broadcast %cst_23 : f32 to vector<128x256xf32>
    %47 = arith.addf %45, %46 : vector<128x256xf32>
    %48 = tpu.reciprocal %47 {approx = true} : vector<128x256xf32> -> vector<128x256xf32>
    %49 = arith.mulf %45, %48 : vector<128x256xf32>
    %50 = arith.mulf %39, %49 : vector<128x256xf32>
    %51 = arith.truncf %50 : vector<128x256xf32> to vector<128x256xbf16>
    %c0_24 = arith.constant 0 : index
    %c0_25 = arith.constant 0 : index
    %52 = vector.load %arg8[%c0_24, %c0_25] : memref<256x128xbf16, #tpu.memory_space<vmem>>, vector<256x128xbf16>
    %cst_26 = arith.constant dense<0.000000e+00> : vector<128x128xf32>
    %53 = tpu.matmul %51, %52, %cst_26 {dimension_numbers = #tpu.dot_dimension_numbers<[1], [0], [0], [1], [0, 0, 1, 1], [], []>} : vector<128x256xbf16>, vector<256x128xbf16>, vector<128x128xf32> -> vector<128x128xf32>
    %c0_27 = arith.constant 0 : index
    %c0_28 = arith.constant 0 : index
    %54 = vector.load %arg9[%c0_27, %c0_28] : memref<1x128xf32, #tpu.memory_space<vmem>>, vector<1x128xf32>
    %55 = vector.broadcast %54 : vector<1x128xf32> to vector<128x128xf32>
    %56 = arith.addf %53, %55 : vector<128x128xf32>
    %57 = arith.truncf %56 : vector<128x128xf32> to vector<128x128xbf16>
    %c0_29 = arith.constant 0 : index
    %c0_30 = arith.constant 0 : index
    %58 = vector.load %arg10[%c0_29, %c0_30] : memref<128x128xbf16, #tpu.memory_space<vmem>>, vector<128x128xbf16>
    tpu.vector_store %arg10[%c0_29, %c0_30], %57 {strides = array<i32>} : memref<128x128xbf16, #tpu.memory_space<vmem>>, vector<128x128xbf16>,
    return
  }
  func.func @transform_0(%arg0: i32) -> (i32, i32) {
    %c0_i32 = arith.constant 0 : i32
    %c0_i32_0 = arith.constant 0 : i32
    return %arg0, %c0_i32 : i32, i32
  }
  func.func @transform_1(%arg0: i32) -> (i32, i32) {
    %c0_i32 = arith.constant 0 : i32
    %c0_i32_0 = arith.constant 0 : i32
    %c0_i32_1 = arith.constant 0 : i32
    return %c0_i32, %c0_i32_0 : i32, i32
  }
  func.func @transform_2(%arg0: i32) -> (i32, i32) {
    %c0_i32 = arith.constant 0 : i32
    %c0_i32_0 = arith.constant 0 : i32
    %c0_i32_1 = arith.constant 0 : i32
    return %c0_i32, %c0_i32_0 : i32, i32
  }
  func.func @transform_3(%arg0: i32) -> (i32, i32) {
    %c0_i32 = arith.constant 0 : i32
    %c0_i32_0 = arith.constant 0 : i32
    %c0_i32_1 = arith.constant 0 : i32
    return %c0_i32, %c0_i32_0 : i32, i32
  }
  func.func @transform_4(%arg0: i32) -> (i32, i32) {
    %c0_i32 = arith.constant 0 : i32
    %c0_i32_0 = arith.constant 0 : i32
    %c0_i32_1 = arith.constant 0 : i32
    return %c0_i32, %c0_i32_0 : i32, i32
  }
  func.func @transform_5(%arg0: i32) -> (i32, i32) {
    %c0_i32 = arith.constant 0 : i32
    %c0_i32_0 = arith.constant 0 : i32
    %c0_i32_1 = arith.constant 0 : i32
    return %c0_i32, %c0_i32_0 : i32, i32
  }
  func.func @transform_6(%arg0: i32) -> (i32, i32) {
    %c0_i32 = arith.constant 0 : i32
    %c0_i32_0 = arith.constant 0 : i32
    %c0_i32_1 = arith.constant 0 : i32
    return %c0_i32, %c0_i32_0 : i32, i32
  }
  func.func @transform_7(%arg0: i32) -> (i32, i32) {
    %c0_i32 = arith.constant 0 : i32
    %c0_i32_0 = arith.constant 0 : i32
    %c0_i32_1 = arith.constant 0 : i32
    return %c0_i32, %c0_i32_0 : i32, i32
  }
  func.func @transform_8(%arg0: i32) -> (i32, i32) {
    %c0_i32 = arith.constant 0 : i32
    %c0_i32_0 = arith.constant 0 : i32
    %c0_i32_1 = arith.constant 0 : i32
    return %c0_i32, %c0_i32_0 : i32, i32
  }
  func.func @transform_9(%arg0: i32) -> (i32, i32) {
    %c0_i32 = arith.constant 0 : i32
    %c0_i32_0 = arith.constant 0 : i32
    return %arg0, %c0_i32 : i32, i32
  }
}

</mosaic_0001>

<bundles_post_ra>
// kernel: mlp_forward.1
= control target key start
LH: loop header
LB: loop body
LE: loop exit
PB: predicated region body
PF: predicated region fallthrough
CT: control target
= control target key end

     0   :  { %14 = vsyncpa [#allocation3], 0  ;;  %s4294_s0 = inlined_call_operand.vmem [shape: bf16[128,128], index: 0, kind: input, shape index: {}]   ;;  %s4295_s1 = inlined_call_operand.hbm [shape: bf16[128,256], index: 1, kind: input, shape index: {}]   ;;  %s4296_s2 = inlined_call_operand.hbm [shape: f32[1,256], index: 2, kind: input, shape index: {}]   ;;  %s4297_s3 = inlined_call_operand.hbm [shape: bf16[256,256], index: 3, kind: input, shape index: {}]   ;;  %s4298_s4 = inlined_call_operand.hbm [shape: f32[1,256], index: 4, kind: input, shape index: {}]   ;;  %s4299_s5 = inlined_call_operand.hbm [shape: bf16[256,256], index: 5, kind: input, shape index: {}]   ;;  %s4300_s6 = inlined_call_operand.hbm [shape: f32[1,256], index: 6, kind: input, shape index: {}]   ;;  %s4301_s7 = inlined_call_operand.vmem [shape: bf16[256,128], index: 7, kind: input, shape index: {}]   ;;  %s4302_s8 = inlined_call_operand.hbm [shape: f32[1,128], index: 8, kind: input, shape index: {}]   ;;  %s4303_s9 = inlined_call_operand.vmem [shape: bf16[128,128], index: 9, kind: output, shape index: {}]  }
   0x1   :  { %15 = vsyncpa [#allocation5], 0 }
   0x2   :  { %16 = vsyncpa [#allocation8], 0  ;;  %s38_s11 = sshll.u32 %s4296_s2, 4  ;;  %s39_s11 = int_to_ptr.hbm [resolvable:$true] %s38_s11 }
   0x3   :  { %17 = vsyncpa [#allocation11], 0  ;;  %s3504_s12 = smov [#allocation4]   ;;  %s62_s16 = sshll.u32 %s4298_s4, 4  ;;  %s63_s16 = int_to_ptr.hbm [resolvable:$true] %s62_s16 }
   0x4   :  { %s40_s13 = sshll.u32 %s3504_s12, 4  ;;  %s3505_s17 = smov [#allocation7]   ;;  %s41_s13 = int_to_ptr.vmem [resolvable:$true] %s40_s13 }
   0x5   :  { %43 = dma.hbm_to_vmem [thread:$0]  %s39_s11, 32, %s41_s13, [#allocation5]  }
   0x6   :  { %s64_s18 = sshll.u32 %s3505_s17, 4  ;;  %s86_s21 = sshll.u32 %s4300_s6, 4  ;;  %s65_s18 = int_to_ptr.vmem [resolvable:$true] %s64_s18  ;;  %s87_s21 = int_to_ptr.hbm [resolvable:$true] %s86_s21 }
   0x7   :  { %67 = dma.hbm_to_vmem [thread:$0]  %s63_s16, 32, %s65_s18, [#allocation8]  }
   0x8   :  { %s24_s23 = sshll.u32 %s4295_s1, 4  ;;  %s3506_s24 = smov [#allocation10]   ;;  %s25_s23 = int_to_ptr.hbm [resolvable:$true] %s24_s23 }
   0x9   :  { %s88_s25 = sshll.u32 %s3506_s24, 4  ;;  %s3507_s4 = smov [#allocation2]   ;;  %s89_s25 = int_to_ptr.vmem [resolvable:$true] %s88_s25 }
   0xa   :  { %91 = dma.hbm_to_vmem [thread:$0]  %s87_s21, 32, %s89_s25, [#allocation11]  }
   0xb   :  { %s26_s26 = sshll.u32 %s3507_s4, 4  ;;  %s3508_s27 = smov 128   ;;  %s27_s26 = int_to_ptr.vmem [resolvable:$true] %s26_s26 }
   0xc   :  { %s3509_s28 = smov 8   ;;  %s48_s30 = sshll.u32 %s4297_s3, 4  ;;  %s49_s30 = int_to_ptr.hbm [resolvable:$true] %s48_s30 }
   0xd   :  { %32 = dma.hbm_to_vmem [thread:$0]  %s25_s23, 2048, %s27_s26, [#allocation3], %s3508_s27, %s3508_s27, %s3509_s28  }
   0xe   :  { %s3510_s10 = smov [#allocation6]   ;;  %s72_s13 = sshll.u32 %s4299_s5, 4  ;;  %s73_s13 = int_to_ptr.hbm [resolvable:$true] %s72_s13 }
   0xf   :  { %s50_s11 = sshll.u32 %s3510_s10, 4  ;;  %s3511_s14 = smov [#allocation9]   ;;  %s51_s11 = int_to_ptr.vmem [resolvable:$true] %s50_s11 }
  0x10   :  { %56 = dma.hbm_to_vmem [thread:$0]  %s49_s30, 4096, %s51_s11, [#allocation5], %s3508_s27, %s3508_s27, %s3509_s28  }
  0x11   :  { %s74_s15 = sshll.u32 %s3511_s14, 4  ;;  %s99_s18 = sshll.u32 %s4302_s8, 4  ;;  %s75_s15 = int_to_ptr.vmem [resolvable:$true] %s74_s15  ;;  %s100_s18 = int_to_ptr.hbm [resolvable:$true] %s99_s18 }
  0x12   :  { %80 = dma.hbm_to_vmem [thread:$0]  %s73_s13, 4096, %s75_s15, [#allocation8], %s3508_s27, %s3508_s27, %s3509_s28  }
  0x13   :  { %s3512_s3 = smov [#allocation12]  }
  0x14   :  { %s101_s19 = sshll.u32 %s3512_s3, 4  ;;  %s102_s19 = int_to_ptr.vmem [resolvable:$true] %s101_s19 }
  0x15   :  { %104 = dma.hbm_to_vmem [thread:$0]  %s100_s18, 16, %s102_s19, [#allocation11]  }
  0x16   :  { %3496 = dma.done.wait [#allocation3], 2048  }
  0x17   :  { %3497 = vsyncadd [#allocation3], 4294965248 }
  0x18   :  { %3498 = dma.done.wait [#allocation5], 4128  }
  0x19   :  { %3499 = vsyncadd [#allocation5], 4294963168 }
  0x1a   :  { %3500 = dma.done.wait [#allocation8], 4128  }
  0x1b   :  { %3501 = vsyncadd [#allocation8], 4294963168 }
  0x1c   :  { %3502 = dma.done.wait [#allocation11], 48  }
  0x1d   :  { %3503 = vsyncadd [#allocation11], 4294967248  ;;  %v2457_v0 = vld [vmem:[#allocation2 + $0x70] sm:$0xf]  ;;  %v2806_v1 = vld [vmem:[#allocation2 + $0x74] sm:$0xf0] }
  0x1e   :  { %v2805_v2 = vld [vmem:[#allocation2 + $0x74] sm:$0xf]  ;;  %v2458_v3 = vor.u32 %v2806_v1, %v2457_v0  ;;  %v2459_v4 = vld [vmem:[#allocation2 + $0x78] sm:$0xf0]  ;;  %v2449_v5 = vld [vmem:[#allocation2 + $0x60] sm:$0xf] }
  0x1f   :  { %v2804_v6 = vld [vmem:[#allocation2 + $0x64] sm:$0xf0]  ;;  %v2462_v7 = vor.u32 %v2805_v2, %v2459_v4  ;;  %v2803_v8 = vld [vmem:[#allocation2 + $0x64] sm:$0xf]  ;;  %v2451_v9 = vld [vmem:[#allocation2 + $0x68] sm:$0xf0] }
  0x20   :  { %299 = vmatpush.bf16.msra.mxu0 %v2458_v3  ;;  %v2450_v10 = vor.u32 %v2804_v6, %v2449_v5  ;;  %v2454_v11 = vor.u32 %v2803_v8, %v2451_v9  ;;  %v2441_v12 = vld [vmem:[#allocation2 + $0x50] sm:$0xf]  ;;  %v2802_v13 = vld [vmem:[#allocation2 + $0x54] sm:$0xf0]  ;;  %v2801_v14 = vld [vmem:[#allocation2 + $0x54] sm:$0xf] }
  0x21   :  { %348 = vmatpush.bf16.msra.mxu1 %v2462_v7  ;;  %v2443_v15 = vld [vmem:[#allocation2 + $0x58] sm:$0xf0]  ;;  %v2442_v16 = vor.u32 %v2802_v13, %v2441_v12  ;;  %v2433_v18 = vld [vmem:[#allocation2 + $0x40] sm:$0xf]  ;;  %v2800_v19 = vld [vmem:[#allocation2 + $0x44] sm:$0xf0] }
  0x22   :  { %v2446_v17 = vor.u32 %v2801_v14, %v2443_v15  ;;  %v2799_v20 = vld [vmem:[#allocation2 + $0x44] sm:$0xf]  ;;  %v2435_v21 = vld [vmem:[#allocation2 + $0x48] sm:$0xf0]  ;;  %v2434_v22 = vor.u32 %v2800_v19, %v2433_v18  ;;  %v2425_v24 = vld [vmem:[#allocation2 + $0x30] sm:$0xf] }
  0x23   :  { %v2438_v23 = vor.u32 %v2799_v20, %v2435_v21  ;;  %v2798_v25 = vld [vmem:[#allocation2 + $0x34] sm:$0xf0]  ;;  %v2797_v26 = vld [vmem:[#allocation2 + $0x34] sm:$0xf]  ;;  %v2427_v27 = vld [vmem:[#allocation2 + $0x38] sm:$0xf0] }
  0x24   :  { %300 = vmatpush.bf16.msra.mxu0 %v2450_v10  ;;  %v2426_v28 = vor.u32 %v2798_v25, %v2425_v24  ;;  %v2430_v29 = vor.u32 %v2797_v26, %v2427_v27  ;;  %v2417_v30 = vld [vmem:[#allocation2 + $0x20] sm:$0xf]  ;;  %v2796_v31 = vld [vmem:[#allocation2 + $0x24] sm:$0xf0]  ;;  %v2795_v32 = vld [vmem:[#allocation2 + $0x24] sm:$0xf] }
  0x25   :  { %349 = vmatpush.bf16.msra.mxu1 %v2454_v11  ;;  %v2419_v33 = vld [vmem:[#allocation2 + $0x28] sm:$0xf0]  ;;  %v2418_v34 = vor.u32 %v2796_v31, %v2417_v30  ;;  %v2409_v36 = vld [vmem:[#allocation2 + $0x10] sm:$0xf]  ;;  %v2794_v37 = vld [vmem:[#allocation2 + $0x14] sm:$0xf0] }
  0x26   :  { %v2422_v35 = vor.u32 %v2795_v32, %v2419_v33  ;;  %v2793_v38 = vld [vmem:[#allocation2 + $0x14] sm:$0xf]  ;;  %v2411_v39 = vld [vmem:[#allocation2 + $0x18] sm:$0xf0]  ;;  %v2410_v40 = vor.u32 %v2794_v37, %v2409_v36  ;;  %v2401_v42 = vld [vmem:[#allocation2] sm:$0xf] }
  0x27   :  { %v2414_v41 = vor.u32 %v2793_v38, %v2411_v39  ;;  %v2792_v43 = vld [vmem:[#allocation2 + $0x4] sm:$0xf0]  ;;  %v2791_v44 = vld [vmem:[#allocation2 + $0x4] sm:$0xf]  ;;  %v2403_v45 = vld [vmem:[#allocation2 + $0x8] sm:$0xf0] }
  0x28   :  { %301 = vmatpush.bf16.msra.mxu0 %v2442_v16  ;;  %v2402_v46 = vor.u32 %v2792_v43, %v2401_v42  ;;  %v2406_v47 = vor.u32 %v2791_v44, %v2403_v45  ;;  %v2783_v48 = vld [vmem:[%s4294_s0] sm:$0xff]  ;;  %v2821_v49 = vld [vmem:[#allocation6 + $0x74] sm:$0xf]  ;;  %v2784_v52 = vld [vmem:[%s4294_s0 + $0x8] sm:$0xff] }
  0x29   :  { %350 = vmatpush.bf16.msra.mxu1 %v2446_v17  ;;  %v2523_v50 = vld [vmem:[#allocation6 + $0x78] sm:$0xf0]  ;;  %v2837_v53 = vld [vmem:[#allocation6 + $0xf4] sm:$0xf]  ;;  %v2819_v55 = vld [vmem:[#allocation6 + $0x64] sm:$0xf] }
  0x2a   :  { %v2526_v51 = vor.u32 %v2821_v49, %v2523_v50  ;;  %v2587_v54 = vld [vmem:[#allocation6 + $0xf8] sm:$0xf0]  ;;  %v2515_v57 = vld [vmem:[#allocation6 + $0x68] sm:$0xf0]  ;;  %v2835_v60 = vld [vmem:[#allocation6 + $0xe4] sm:$0xf] }
  0x2b   :  { %v2590_v56 = vor.u32 %v2837_v53, %v2587_v54  ;;  %v2518_v58 = vor.u32 %v2819_v55, %v2515_v57  ;;  %v2785_v59 = vld [vmem:[%s4294_s0 + $0x10] sm:$0xff]  ;;  %v2507_v0 = vld [vmem:[#allocation6 + $0x58] sm:$0xf0]  ;;  %v2815_v5 = vld [vmem:[#allocation6 + $0x44] sm:$0xf] }
  0x2c   :  { %302 = vmatpush.bf16.msra.mxu0 %v2434_v22  ;;  %v2579_v61 = vld [vmem:[#allocation6 + $0xe8] sm:$0xf0]  ;;  %v2817_v62 = vld [vmem:[#allocation6 + $0x54] sm:$0xf]  ;;  %v2571_v4 = vld [vmem:[#allocation6 + $0xd8] sm:$0xf0] }
  0x2d   :  { %351 = vmatpush.bf16.msra.mxu1 %v2438_v23  ;;  %v2582_v63 = vor.u32 %v2835_v60, %v2579_v61  ;;  %v2510_v1 = vor.u32 %v2817_v62, %v2507_v0  ;;  %v2786_v2 = vld [vmem:[%s4294_s0 + $0x18] sm:$0xff]  ;;  %v2499_v7 = vld [vmem:[#allocation6 + $0x48] sm:$0xf0]  ;;  %v2787_v9 = vld [vmem:[%s4294_s0 + $0x20] sm:$0xff] }
  0x2e   :  { %v2833_v3 = vld [vmem:[#allocation6 + $0xd4] sm:$0xf]  ;;  %v2502_v8 = vor.u32 %v2815_v5, %v2499_v7  ;;  %v2831_v10 = vld [vmem:[#allocation6 + $0xc4] sm:$0xf]  ;;  %v2563_v11 = vld [vmem:[#allocation6 + $0xc8] sm:$0xf0] }
  0x2f   :  { %v2574_v6 = vor.u32 %v2833_v3, %v2571_v4  ;;  %v2813_v12 = vld [vmem:[#allocation6 + $0x34] sm:$0xf]  ;;  %v2566_v13 = vor.u32 %v2831_v10, %v2563_v11  ;;  %v2491_v14 = vld [vmem:[#allocation6 + $0x38] sm:$0xf0]  ;;  %v2788_v16 = vld [vmem:[%s4294_s0 + $0x28] sm:$0xff] }
  0x30   :  { %303 = vmatpush.bf16.msra.mxu0 %v2426_v28  ;;  %v2494_v15 = vor.u32 %v2813_v12, %v2491_v14  ;;  %v2829_v17 = vld [vmem:[#allocation6 + $0xb4] sm:$0xf]  ;;  %v2555_v18 = vld [vmem:[#allocation6 + $0xb8] sm:$0xf0]  ;;  %v2521_v21 = vld [vmem:[#allocation6 + $0x70] sm:$0xf] }
  0x31   :  { %352 = vmatpush.bf16.msra.mxu1 %v2430_v29  ;;  %v2558_v19 = vor.u32 %v2829_v17, %v2555_v18  ;;  %v2789_v20 = vld [vmem:[%s4294_s0 + $0x30] sm:$0xff]  ;;  %v2822_v22 = vld [vmem:[#allocation6 + $0x74] sm:$0xf0]  ;;  %v2513_v27 = vld [vmem:[#allocation6 + $0x60] sm:$0xf] }
  0x32   :  { %v2585_v23 = vld [vmem:[#allocation6 + $0xf0] sm:$0xf]  ;;  %v2522_v24 = vor.u32 %v2822_v22, %v2521_v21  ;;  %v2838_v25 = vld [vmem:[#allocation6 + $0xf4] sm:$0xf0]  ;;  %v2820_v28 = vld [vmem:[#allocation6 + $0x64] sm:$0xf0] }
  0x33   :  { %v2586_v26 = vor.u32 %v2838_v25, %v2585_v23  ;;  %v2577_v29 = vld [vmem:[#allocation6 + $0xe0] sm:$0xf]  ;;  %v2514_v30 = vor.u32 %v2820_v28, %v2513_v27  ;;  %v2836_v31 = vld [vmem:[#allocation6 + $0xe4] sm:$0xf0]  ;;  %v2790_v33 = vld [vmem:[%s4294_s0 + $0x38] sm:$0xff] }
  0x34   :  { %304 = vmatpush.bf16.msra.mxu0 %v2418_v34  ;;  %899 = vmatpush.bf16.msra.mxu2 %v2522_v24  ;;  %v2578_v32 = vor.u32 %v2836_v31, %v2577_v29  ;;  %v2505_v34 = vld [vmem:[#allocation6 + $0x50] sm:$0xf]  ;;  %v2834_v38 = vld [vmem:[#allocation6 + $0xd4] sm:$0xf0]  ;;  %v2561_v42 = vld [vmem:[#allocation6 + $0xc0] sm:$0xf] }
  0x35   :  { %353 = vmatpush.bf16.msra.mxu1 %v2422_v35  ;;  %948 = vmatpush.bf16.msra.mxu3 %v2586_v26  ;;  %v2818_v35 = vld [vmem:[#allocation6 + $0x54] sm:$0xf0]  ;;  %v2569_v36 = vld [vmem:[#allocation6 + $0xd0] sm:$0xf]  ;;  %v2832_v44 = vld [vmem:[#allocation6 + $0xc4] sm:$0xf0] }
  0x36   :  { %v2506_v37 = vor.u32 %v2818_v35, %v2505_v34  ;;  %v2570_v39 = vor.u32 %v2834_v38, %v2569_v36  ;;  %v2562_v45 = vor.u32 %v2832_v44, %v2561_v42  ;;  %v2553_v49 = vld [vmem:[#allocation6 + $0xb0] sm:$0xf]  ;;  %v2811_v54 = vld [vmem:[#allocation6 + $0x24] sm:$0xf]  ;;  %v2483_v55 = vld [vmem:[#allocation6 + $0x28] sm:$0xf0] }
  0x37   :  { %v2486_v57 = vor.u32 %v2811_v54, %v2483_v55  ;;  %v2812_v60 = vld [vmem:[#allocation6 + $0x24] sm:$0xf0]  ;;  %v2545_v0 = vld [vmem:[#allocation6 + $0xa0] sm:$0xf]  ;;  %v2809_v4 = vld [vmem:[#allocation6 + $0x14] sm:$0xf] }
  0x38   :  { %305 = vmatpush.bf16.msra.mxu0 %v2410_v40  ;;  %900 = vmatpush.bf16.msra.mxu2 %v2514_v30  ;;  %v2497_v40 = vld [vmem:[#allocation6 + $0x40] sm:$0xf]  ;;  %v2475_v5 = vld [vmem:[#allocation6 + $0x18] sm:$0xf0]  ;;  %v2473_v11 = vld [vmem:[#allocation6 + $0x10] sm:$0xf] }
  0x39   :  { %354 = vmatpush.bf16.msra.mxu1 %v2414_v41  ;;  %949 = vmatpush.bf16.msra.mxu3 %v2578_v32  ;;  %v2816_v41 = vld [vmem:[#allocation6 + $0x44] sm:$0xf0]  ;;  %v2539_v10 = vld [vmem:[#allocation6 + $0x98] sm:$0xf0]  ;;  %v2810_v12 = vld [vmem:[#allocation6 + $0x14] sm:$0xf0] }
  0x3a   :  { %v2498_v43 = vor.u32 %v2816_v41, %v2497_v40  ;;  %v2826_v17 = vld [vmem:[#allocation6 + $0x94] sm:$0xf0]  ;;  %v2807_v21 = vld [vmem:[#allocation6 + $0x4] sm:$0xf]  ;;  %v2467_v22 = vld [vmem:[#allocation6 + $0x8] sm:$0xf0] }
  0x3b   :  { %v2470_v24 = vor.u32 %v2807_v21, %v2467_v22  ;;  %v2823_v25 = vld [vmem:[#allocation6 + $0x84] sm:$0xf]  ;;  %v2531_v26 = vld [vmem:[#allocation6 + $0x88] sm:$0xf0]  ;;  %v2465_v29 = vld [vmem:[#allocation6] sm:$0xf] }
  0x3c   :  { %306 = vmatpush.bf16.msra.mxu0 %v2402_v46  ;;  %901 = vmatpush.bf16.msra.mxu2 %v2506_v37  ;;  %v165_v46 = vld [vmem:[#allocation4] sm:$0x3]  ;;  %v2534_v28 = vor.u32 %v2823_v25, %v2531_v26  ;;  %v2808_v30 = vld [vmem:[#allocation6 + $0x4] sm:$0xf0]  ;;  %v2529_v32 = vld [vmem:[#allocation6 + $0x80] sm:$0xf] }
  0x3d   :  { %355 = vmatpush.bf16.msra.mxu1 %v2406_v47  ;;  %950 = vmatpush.bf16.msra.mxu3 %v2570_v39  ;;  %v2489_v47 = vld [vmem:[#allocation6 + $0x30] sm:$0xf]  ;;  %v3608_v53 = vperm.slane %v165_v46, 0  ;;  %v3610_v61 = vperm.slane %v165_v46, 1  ;;  %v2466_v31 = vor.u32 %v2808_v30, %v2465_v29 }
  0x3f   :  { %307 = vmatmul.bf16.vlgmr.msra.gmra.mxu0 %v2783_v48 }
  0x40   :  { %356 = vmatmul.bf16.vlgmr.msra.gmra.mxu1 %v2783_v48  ;;  %997 = vmatpush.bf16.msrb.mxu0 %v2526_v51  ;;  %v2814_v48 = vld [vmem:[#allocation6 + $0x34] sm:$0xf0] }
  0x41   :  { %1046 = vmatpush.bf16.msrb.mxu1 %v2590_v56  ;;  %902 = vmatpush.bf16.msra.mxu2 %v2498_v43  ;;  %v2490_v50 = vor.u32 %v2814_v48, %v2489_v47  ;;  %v2830_v51 = vld [vmem:[#allocation6 + $0xb4] sm:$0xf0]  ;;  %v2827_v56 = vld [vmem:[#allocation6 + $0xa4] sm:$0xf] }
  0x42   :  { %951 = vmatpush.bf16.msra.mxu3 %v2562_v45 }
  0x44   :  { %998 = vmatpush.bf16.msrb.mxu0 %v2518_v58  ;;  %v2547_v58 = vld [vmem:[#allocation6 + $0xa8] sm:$0xf0] }
  0x45   :  { %1047 = vmatpush.bf16.msrb.mxu1 %v2582_v63  ;;  %903 = vmatpush.bf16.msra.mxu2 %v2490_v50  ;;  %v2550_v62 = vor.u32 %v2827_v56, %v2547_v58 }
  0x48   :  { %999 = vmatpush.bf16.msrb.mxu0 %v2510_v1  ;;  %v2828_v1 = vld [vmem:[#allocation6 + $0xa4] sm:$0xf0] }
  0x49   :  { %1048 = vmatpush.bf16.msrb.mxu1 %v2574_v6  ;;  %v2825_v6 = vld [vmem:[#allocation6 + $0x94] sm:$0xf] }
  0x4a   :  { %v2542_v14 = vor.u32 %v2825_v6, %v2539_v10 }
  0x4c   :  { %1000 = vmatpush.bf16.msrb.mxu0 %v2502_v8 }
  0x4d   :  { %1049 = vmatpush.bf16.msrb.mxu1 %v2566_v13 }
  0x4f   :  { %312 = vmatmul.bf16.gmra.mxu0 %v2784_v52 }
  0x50   :  { %361 = vmatmul.bf16.gmra.mxu1 %v2784_v52  ;;  %1001 = vmatpush.bf16.msrb.mxu0 %v2494_v15  ;;  %v2554_v52 = vor.u32 %v2830_v51, %v2553_v49  ;;  %v2474_v15 = vor.u32 %v2810_v12, %v2473_v11 }
  0x51   :  { %1050 = vmatpush.bf16.msrb.mxu1 %v2558_v19 }
  0x52   :  { %952 = vmatpush.bf16.msra.mxu3 %v2554_v52 }
  0x54   :  { %1002 = vmatpush.bf16.msrb.mxu0 %v2486_v57 }
  0x55   :  { %1051 = vmatpush.bf16.msrb.mxu1 %v2550_v62 }
  0x59   :  { %1052 = vmatpush.bf16.msrb.mxu1 %v2542_v14 }
  0x5d   :  { %1053 = vmatpush.bf16.msrb.mxu1 %v2534_v28 }
  0x5f   :  { %317 = vmatmul.bf16.gmra.mxu0 %v2785_v59 }
  0x60   :  { %366 = vmatmul.bf16.gmra.mxu1 %v2785_v59  ;;  %v2481_v59 = vld [vmem:[#allocation6 + $0x20] sm:$0xf] }
  0x61   :  { %v2482_v63 = vor.u32 %v2812_v60, %v2481_v59 }
  0x63   :  { %904 = vmatpush.bf16.msra.mxu2 %v2482_v63 }
  0x67   :  { %905 = vmatpush.bf16.msra.mxu2 %v2474_v15 }
  0x6b   :  { %906 = vmatpush.bf16.msra.mxu2 %v2466_v31 }
  0x6f   :  { %322 = vmatmul.bf16.gmra.mxu0 %v2786_v2 }
  0x70   :  { %371 = vmatmul.bf16.gmra.mxu1 %v2786_v2  ;;  %v2546_v2 = vor.u32 %v2828_v1, %v2545_v0 }
  0x72   :  { %953 = vmatpush.bf16.msra.mxu3 %v2546_v2 }
  0x7f   :  { %327 = vmatmul.bf16.gmra.mxu0 %v2787_v9 }
  0x80   :  { %376 = vmatmul.bf16.gmra.mxu1 %v2787_v9  ;;  %v2478_v9 = vor.u32 %v2809_v4, %v2475_v5 }
  0x82   :  { %1003 = vmatpush.bf16.msrb.mxu0 %v2478_v9 }
  0x86   :  { %1004 = vmatpush.bf16.msrb.mxu0 %v2470_v24 }
  0x8f   :  { %332 = vmatmul.bf16.gmra.mxu0 %v2788_v16 }
  0x90   :  { %381 = vmatmul.bf16.gmra.mxu1 %v2788_v16  ;;  %v2537_v16 = vld [vmem:[#allocation6 + $0x90] sm:$0xf] }
  0x91   :  { %v2538_v19 = vor.u32 %v2826_v17, %v2537_v16 }
  0x93   :  { %954 = vmatpush.bf16.msra.mxu3 %v2538_v19 }
  0x9f   :  { %337 = vmatmul.bf16.gmra.mxu0 %v2789_v20 }
  0xa0   :  { %386 = vmatmul.bf16.gmra.mxu1 %v2789_v20 }
  0xaf   :  { %342 = vmatmul.bf16.gmra.mxu0 %v2790_v33 }
  0xb0   :  { %391 = vmatmul.bf16.gmra.mxu1 %v2790_v33  ;;  %v2824_v33 = vld [vmem:[#allocation6 + $0x84] sm:$0xf0] }
  0xb1   :  { %v2530_v35 = vor.u32 %v2824_v33, %v2529_v32 }
  0xb3   :  { %955 = vmatpush.bf16.msra.mxu3 %v2530_v35 }
  0xbc   :  { %v308_v3 = vpop.f32.mrf.mxu0 }
  0xbd   :  { %v3613_v7 = vadd.f32 %v308_v3, %v3608_v53  ;;  %v357_v8 = vpop.f32.mrf.mxu1 }
  0xbe   :  { %v3616_v13 = vadd.f32 %v357_v8, %v3610_v61 }
  0xbf   :  { %v397_v18 = vmin.f32 %v3613_v7, 20.0 }
  0xc0   :  { %v398_v20 = vmin.f32 %v3616_v13, 20.0 }
  0xc1   :  { %v429_v23 = vmul.f32 1.442695, %v397_v18 }
  0xc2   :  { %v431_v27 = vmul.f32 1.442695, %v398_v20 }
  0xc3   :  { %2944 = vpow2.f32 %v429_v23 }
  0xc4   :  { %2946 = vpow2.f32 %v431_v27  ;;  %v310_v34 = vpop.f32.mrf.mxu0 }
  0xc5   :  { %v3621_v36 = vadd.f32 %v310_v34, %v3608_v53  ;;  %v359_v37 = vpop.f32.mrf.mxu1 }
  0xc6   :  { %v3624_v38 = vadd.f32 %v359_v37, %v3610_v61 }
  0xc7   :  { %v399_v39 = vmin.f32 %v3621_v36, 20.0 }
  0xc8   :  { %v400_v40 = vmin.f32 %v3624_v38, 20.0 }
  0xc9   :  { %v2945_v41 = vpop.eup %2944  ;;  %v433_v42 = vmul.f32 1.442695, %v399_v39 }
  0xca   :  { %v2947_v43 = vpop.eup %2946  ;;  %v493_v44 = vadd.f32 2.0, %v2945_v41  ;;  %v435_v45 = vmul.f32 1.442695, %v400_v40 }
  0xcb   :  { %v494_v46 = vadd.f32 2.0, %v2947_v43  ;;  %2948 = vpow2.f32 %v433_v42 }
  0xcc   :  { %v525_v47 = vmul.f32 %v2945_v41, %v493_v44  ;;  %2950 = vpow2.f32 %v435_v45  ;;  %v313_v48 = vpop.f32.mrf.mxu0 }
  0xcd   :  { %v526_v49 = vmul.f32 %v2947_v43, %v494_v46  ;;  %v3629_v50 = vadd.f32 %v313_v48, %v3608_v53  ;;  %v362_v51 = vpop.f32.mrf.mxu1 }
  0xce   :  { %v557_v52 = vadd.f32 2.0, %v525_v47  ;;  %v3632_v54 = vadd.f32 %v362_v51, %v3610_v61 }
  0xcf   :  { %v558_v55 = vadd.f32 2.0, %v526_v49  ;;  %v401_v56 = vmin.f32 %v3629_v50, 20.0 }
  0xd0   :  { %v402_v57 = vmin.f32 %v3632_v54, 20.0  ;;  %2952 = vrcp.f32 %v557_v52 }
  0xd1   :  { %v2949_v58 = vpop.eup %2948  ;;  %v437_v59 = vmul.f32 1.442695, %v401_v56  ;;  %2954 = vrcp.f32 %v558_v55 }
  0xd2   :  { %v2951_v60 = vpop.eup %2950  ;;  %v439_v62 = vmul.f32 1.442695, %v402_v57  ;;  %v495_v63 = vadd.f32 2.0, %v2949_v58 }
  0xd3   :  { %2956 = vpow2.f32 %v437_v59  ;;  %v496_v0 = vadd.f32 2.0, %v2951_v60 }
  0xd4   :  { %2958 = vpow2.f32 %v439_v62  ;;  %v315_v1 = vpop.f32.mrf.mxu0  ;;  %v527_v2 = vmul.f32 %v2949_v58, %v495_v63 }
  0xd5   :  { %v3637_v3 = vadd.f32 %v315_v1, %v3608_v53  ;;  %v364_v4 = vpop.f32.mrf.mxu1  ;;  %v528_v5 = vmul.f32 %v2951_v60, %v496_v0 }
  0xd6   :  { %v3640_v6 = vadd.f32 %v364_v4, %v3610_v61  ;;  %v559_v8 = vadd.f32 2.0, %v527_v2  ;;  %v2953_v9 = vpop.eup %2952 }
  0xd7   :  { %v403_v10 = vmin.f32 %v3637_v3, 20.0  ;;  %v560_v11 = vadd.f32 2.0, %v528_v5  ;;  %v2955_v12 = vpop.eup %2954  ;;  %v621_v21 = vmul.f32 %v2953_v9, %v525_v47 }
  0xd8   :  { %v404_v14 = vmin.f32 %v3640_v6, 20.0  ;;  %2960 = vrcp.f32 %v559_v8  ;;  %v622_v24 = vmul.f32 %v2955_v12, %v526_v49 }
  0xd9   :  { %v2957_v15 = vpop.eup %2956  ;;  %v441_v16 = vmul.f32 1.442695, %v403_v10  ;;  %2962 = vrcp.f32 %v560_v11  ;;  %v653_v35 = vmul.f32 %v621_v21, %v3613_v7 }
  0xda   :  { %v2959_v17 = vpop.eup %2958  ;;  %v497_v18 = vadd.f32 2.0, %v2957_v15  ;;  %v443_v19 = vmul.f32 1.442695, %v404_v14  ;;  %v654_v41 = vmul.f32 %v622_v24, %v3616_v13 }
  0xdb   :  { %v498_v20 = vadd.f32 2.0, %v2959_v17  ;;  %2964 = vpow2.f32 %v441_v16 }
  0xdc   :  { %v529_v22 = vmul.f32 %v2957_v15, %v497_v18  ;;  %2966 = vpow2.f32 %v443_v19  ;;  %v318_v23 = vpop.f32.mrf.mxu0 }
  0xdd   :  { %v530_v25 = vmul.f32 %v2959_v17, %v498_v20  ;;  %v3645_v26 = vadd.f32 %v318_v23, %v3608_v53  ;;  %v367_v27 = vpop.f32.mrf.mxu1 }
  0xde   :  { %v2961_v28 = vpop.eup %2960  ;;  %v561_v29 = vadd.f32 2.0, %v529_v22  ;;  %v3648_v30 = vadd.f32 %v367_v27, %v3610_v61 }
  0xdf   :  { %v2963_v31 = vpop.eup %2962  ;;  %v562_v32 = vadd.f32 2.0, %v530_v25  ;;  %v405_v33 = vmin.f32 %v3645_v26, 20.0  ;;  %v623_v34 = vmul.f32 %v2961_v28, %v527_v2 }
  0xe0   :  { %v406_v37 = vmin.f32 %v3648_v30, 20.0  ;;  %v624_v39 = vmul.f32 %v2963_v31, %v528_v5  ;;  %2968 = vrcp.f32 %v561_v29 }
  0xe1   :  { %v2965_v40 = vpop.eup %2964  ;;  %v445_v42 = vmul.f32 1.442695, %v405_v33  ;;  %v655_v43 = vmul.f32 %v623_v34, %v3621_v36  ;;  %2970 = vrcp.f32 %v562_v32 }
  0xe2   :  { %v2967_v44 = vpop.eup %2966  ;;  %v447_v45 = vmul.f32 1.442695, %v406_v37  ;;  %v656_v46 = vmul.f32 %v624_v39, %v3624_v38  ;;  %v499_v47 = vadd.f32 2.0, %v2965_v40 }
  0xe3   :  { %2972 = vpow2.f32 %v445_v42  ;;  %v685_v48 = vpack.c.bf16 %v655_v43, %v653_v35  ;;  %v500_v49 = vadd.f32 2.0, %v2967_v44 }
  0xe4   :  { %2974 = vpow2.f32 %v447_v45  ;;  %v320_v7 = vpop.f32.mrf.mxu0  ;;  %v686_v51 = vpack.c.bf16 %v656_v46, %v654_v41  ;;  %v531_v52 = vmul.f32 %v2965_v40, %v499_v47 }
  0xe5   :  { %v3657_v55 = vadd.f32 %v320_v7, %v3608_v53  ;;  %v369_v13 = vpop.f32.mrf.mxu1  ;;  %907 = vmatmul.bf16.vlgmr.msra.gmra.mxu2 %v685_v48  ;;  %1005 = vmatmul.bf16.vlgmr.msrb.gmra.mxu0 %v685_v48  ;;  %v532_v36 = vmul.f32 %v2967_v44, %v500_v49 }
  0xe6   :  { %v3660_v56 = vadd.f32 %v369_v13, %v3610_v61  ;;  %956 = vmatmul.bf16.vlgmr.msra.gmra.mxu3 %v686_v51  ;;  %1054 = vmatmul.bf16.vlgmr.msrb.gmra.mxu1 %v686_v51  ;;  %v563_v38 = vadd.f32 2.0, %v531_v52  ;;  %v2969_v57 = vpop.eup %2968 }
  0xe7   :  { %v407_v58 = vmin.f32 %v3657_v55, 20.0  ;;  %v564_v59 = vadd.f32 2.0, %v532_v36  ;;  %v2971_v60 = vpop.eup %2970  ;;  %v625_v8 = vmul.f32 %v2969_v57, %v529_v22 }
  0xe8   :  { %v408_v62 = vmin.f32 %v3660_v56, 20.0  ;;  %2976 = vrcp.f32 %v563_v38  ;;  %v626_v11 = vmul.f32 %v2971_v60, %v530_v25 }
  0xe9   :  { %v2973_v63 = vpop.eup %2972  ;;  %v449_v0 = vmul.f32 1.442695, %v407_v58  ;;  %2978 = vrcp.f32 %v564_v59  ;;  %v657_v22 = vmul.f32 %v625_v8, %v3629_v50 }
  0xea   :  { %v2975_v1 = vpop.eup %2974  ;;  %v501_v2 = vadd.f32 2.0, %v2973_v63  ;;  %v451_v4 = vmul.f32 1.442695, %v408_v62  ;;  %v658_v28 = vmul.f32 %v626_v11, %v3632_v54 }
  0xeb   :  { %v502_v5 = vadd.f32 2.0, %v2975_v1  ;;  %2980 = vpow2.f32 %v449_v0 }
  0xec   :  { %v533_v9 = vmul.f32 %v2973_v63, %v501_v2  ;;  %2982 = vpow2.f32 %v451_v4  ;;  %v323_v10 = vpop.f32.mrf.mxu0 }
  0xed   :  { %v534_v12 = vmul.f32 %v2975_v1, %v502_v5  ;;  %v3665_v14 = vadd.f32 %v323_v10, %v3608_v53  ;;  %v372_v15 = vpop.f32.mrf.mxu1 }
  0xee   :  { %v2977_v16 = vpop.eup %2976  ;;  %v565_v17 = vadd.f32 2.0, %v533_v9  ;;  %v3668_v18 = vadd.f32 %v372_v15, %v3610_v61 }
  0xef   :  { %v2979_v19 = vpop.eup %2978  ;;  %v566_v20 = vadd.f32 2.0, %v534_v12  ;;  %v409_v21 = vmin.f32 %v3665_v14, 20.0  ;;  %v627_v23 = vmul.f32 %v2977_v16, %v531_v52 }
  0xf0   :  { %v410_v24 = vmin.f32 %v3668_v18, 20.0  ;;  %v628_v25 = vmul.f32 %v2979_v19, %v532_v36  ;;  %2984 = vrcp.f32 %v565_v17 }
  0xf1   :  { %v2981_v27 = vpop.eup %2980  ;;  %v453_v29 = vmul.f32 1.442695, %v409_v21  ;;  %v659_v31 = vmul.f32 %v627_v23, %v3637_v3  ;;  %2986 = vrcp.f32 %v566_v20 }
  0xf2   :  { %v2983_v32 = vpop.eup %2982  ;;  %v455_v33 = vmul.f32 1.442695, %v410_v24  ;;  %v660_v34 = vmul.f32 %v628_v25, %v3640_v6  ;;  %v503_v35 = vadd.f32 2.0, %v2981_v27 }
  0xf3   :  { %2988 = vpow2.f32 %v453_v29  ;;  %v687_v37 = vpack.c.bf16 %v659_v31, %v657_v22  ;;  %v504_v39 = vadd.f32 2.0, %v2983_v32 }
  0xf4   :  { %2990 = vpow2.f32 %v455_v33  ;;  %v325_v50 = vpop.f32.mrf.mxu0  ;;  %v688_v40 = vpack.c.bf16 %v660_v34, %v658_v28  ;;  %v535_v41 = vmul.f32 %v2981_v27, %v503_v35 }
  0xf5   :  { %v3677_v42 = vadd.f32 %v325_v50, %v3608_v53  ;;  %v374_v54 = vpop.f32.mrf.mxu1  ;;  %912 = vmatmul.bf16.gmra.mxu2 %v687_v37  ;;  %1010 = vmatmul.bf16.gmra.mxu0 %v687_v37  ;;  %v536_v3 = vmul.f32 %v2983_v32, %v504_v39 }
  0xf6   :  { %v3680_v43 = vadd.f32 %v374_v54, %v3610_v61  ;;  %961 = vmatmul.bf16.gmra.mxu3 %v688_v40  ;;  %1059 = vmatmul.bf16.gmra.mxu1 %v688_v40  ;;  %v567_v6 = vadd.f32 2.0, %v535_v41  ;;  %v2985_v44 = vpop.eup %2984 }
  0xf7   :  { %v411_v45 = vmin.f32 %v3677_v42, 20.0  ;;  %v568_v46 = vadd.f32 2.0, %v536_v3  ;;  %v2987_v47 = vpop.eup %2986  ;;  %v629_v38 = vmul.f32 %v2985_v44, %v533_v9 }
  0xf8   :  { %v412_v48 = vmin.f32 %v3680_v43, 20.0  ;;  %2992 = vrcp.f32 %v567_v6  ;;  %v630_v59 = vmul.f32 %v2987_v47, %v534_v12 }
  0xf9   :  { %v2989_v49 = vpop.eup %2988  ;;  %v457_v7 = vmul.f32 1.442695, %v411_v45  ;;  %2994 = vrcp.f32 %v568_v46  ;;  %v661_v9 = vmul.f32 %v629_v38, %v3645_v26  ;;  %v2854_v45 = vld [vmem:[#allocation9 + $0x74] sm:$0xf0]  ;;  %v2713_v46 = vld [vmem:[#allocation9 + $0xf0] sm:$0xf] }
  0xfa   :  { %v2991_v51 = vpop.eup %2990  ;;  %v505_v52 = vadd.f32 2.0, %v2989_v49  ;;  %v459_v13 = vmul.f32 1.442695, %v412_v48  ;;  %v662_v16 = vmul.f32 %v630_v59, %v3648_v30 }
  0xfb   :  { %v506_v36 = vadd.f32 2.0, %v2991_v51  ;;  %2996 = vpow2.f32 %v457_v7 }
  0xfc   :  { %v537_v57 = vmul.f32 %v2989_v49, %v505_v52  ;;  %2998 = vpow2.f32 %v459_v13  ;;  %v328_v58 = vpop.f32.mrf.mxu0  ;;  %v2853_v52 = vld [vmem:[#allocation9 + $0x74] sm:$0xf]  ;;  %v2651_v13 = vld [vmem:[#allocation9 + $0x78] sm:$0xf0] }
  0xfd   :  { %v538_v60 = vmul.f32 %v2991_v51, %v506_v36  ;;  %v3685_v62 = vadd.f32 %v328_v58, %v3608_v53  ;;  %v377_v63 = vpop.f32.mrf.mxu1  ;;  %v2870_v51 = vld [vmem:[#allocation9 + $0xf4] sm:$0xf0] }
  0xfe   :  { %v2993_v0 = vpop.eup %2992  ;;  %v569_v1 = vadd.f32 2.0, %v537_v57  ;;  %v3688_v2 = vadd.f32 %v377_v63, %v3610_v61  ;;  %v2714_v59 = vor.u32 %v2870_v51, %v2713_v46  ;;  %v2868_v51 = vld [vmem:[#allocation9 + $0xe4] sm:$0xf0] }
  0xff   :  { %v2995_v4 = vpop.eup %2994  ;;  %v570_v5 = vadd.f32 2.0, %v538_v60  ;;  %v413_v8 = vmin.f32 %v3685_v62, 20.0  ;;  %v631_v10 = vmul.f32 %v2993_v0, %v535_v41 }
 0x100   :  { %v414_v11 = vmin.f32 %v3688_v2, 20.0  ;;  %v632_v12 = vmul.f32 %v2995_v4, %v536_v3  ;;  %3000 = vrcp.f32 %v569_v1  ;;  %v2649_v3 = vld [vmem:[#allocation9 + $0x70] sm:$0xf]  ;;  %1646 = vmatpush.bf16.msrb.mxu3 %v2714_v59 }
 0x101   :  { %v2997_v15 = vpop.eup %2996  ;;  %v461_v17 = vmul.f32 1.442695, %v413_v8  ;;  %v663_v19 = vmul.f32 %v631_v10, %v3657_v55  ;;  %3002 = vrcp.f32 %v570_v5  ;;  %v2650_v7 = vor.u32 %v2854_v45, %v2649_v3  ;;  %v2715_v3 = vld [vmem:[#allocation9 + $0xf8] sm:$0xf0] }
 0x102   :  { %v2999_v20 = vpop.eup %2998  ;;  %v463_v21 = vmul.f32 1.442695, %v414_v11  ;;  %v664_v23 = vmul.f32 %v632_v12, %v3660_v56  ;;  %v507_v22 = vadd.f32 2.0, %v2997_v15 }
 0x103   :  { %3004 = vpow2.f32 %v461_v17  ;;  %v689_v24 = vpack.c.bf16 %v663_v19, %v661_v9  ;;  %v508_v25 = vadd.f32 2.0, %v2999_v20  ;;  %1597 = vmatpush.bf16.msrb.mxu2 %v2650_v7  ;;  %v2705_v7 = vld [vmem:[#allocation9 + $0xe0] sm:$0xf] }
 0x104   :  { %3006 = vpow2.f32 %v463_v21  ;;  %v330_v26 = vpop.f32.mrf.mxu0  ;;  %v690_v27 = vpack.c.bf16 %v664_v23, %v662_v16  ;;  %v539_v28 = vmul.f32 %v2997_v15, %v507_v22 }
 0x105   :  { %v3697_v29 = vadd.f32 %v330_v26, %v3608_v53  ;;  %v379_v30 = vpop.f32.mrf.mxu1  ;;  %917 = vmatmul.bf16.gmra.mxu2 %v689_v24  ;;  %1015 = vmatmul.bf16.gmra.mxu0 %v689_v24  ;;  %v540_v55 = vmul.f32 %v2999_v20, %v508_v25 }
 0x106   :  { %v3700_v31 = vadd.f32 %v379_v30, %v3610_v61  ;;  %966 = vmatmul.bf16.gmra.mxu3 %v690_v27  ;;  %1064 = vmatmul.bf16.gmra.mxu1 %v690_v27  ;;  %v571_v56 = vadd.f32 2.0, %v539_v28  ;;  %v3001_v32 = vpop.eup %3000 }
 0x107   :  { %v415_v33 = vmin.f32 %v3697_v29, 20.0  ;;  %v572_v34 = vadd.f32 2.0, %v540_v55  ;;  %v3003_v35 = vpop.eup %3002  ;;  %v633_v6 = vmul.f32 %v3001_v32, %v537_v57  ;;  %v2654_v57 = vor.u32 %v2853_v52, %v2651_v13 }
 0x108   :  { %v416_v37 = vmin.f32 %v3700_v31, 20.0  ;;  %3008 = vrcp.f32 %v571_v56  ;;  %v634_v47 = vmul.f32 %v3003_v35, %v538_v60 }
 0x109   :  { %v3005_v39 = vpop.eup %3004  ;;  %v465_v50 = vmul.f32 1.442695, %v415_v33  ;;  %3010 = vrcp.f32 %v572_v34  ;;  %1695 = vmatpush.bf16.msra.mxu0 %v2654_v57  ;;  %v665_v10 = vmul.f32 %v633_v6, %v3665_v14  ;;  %v2641_v6 = vld [vmem:[#allocation9 + $0x60] sm:$0xf]  ;;  %v2851_v57 = vld [vmem:[#allocation9 + $0x64] sm:$0xf] }
 0x10a   :  { %v3007_v40 = vpop.eup %3006  ;;  %v509_v41 = vadd.f32 2.0, %v3005_v39  ;;  %v467_v54 = vmul.f32 1.442695, %v416_v37  ;;  %v666_v15 = vmul.f32 %v634_v47, %v3668_v18 }
 0x10b   :  { %v510_v44 = vadd.f32 2.0, %v3007_v40  ;;  %3012 = vpow2.f32 %v465_v50 }
 0x10c   :  { %v3704_v48 = vmul.f32 %v3005_v39, %v509_v41  ;;  %3014 = vpow2.f32 %v467_v54  ;;  %v333_v49 = vpop.f32.mrf.mxu0 }
 0x10d   :  { %v542_v36 = vmul.f32 %v3007_v40, %v510_v44  ;;  %v3707_v38 = vadd.f32 %v333_v49, %v3608_v53  ;;  %v382_v58 = vpop.f32.mrf.mxu1  ;;  %v2869_v40 = vld [vmem:[#allocation9 + $0xf4] sm:$0xf]  ;;  %v2852_v49 = vld [vmem:[#allocation9 + $0x64] sm:$0xf0] }
 0x10e   :  { %v3009_v63 = vpop.eup %3008  ;;  %v573_v0 = vadd.f32 2.0, %v3704_v48  ;;  %v3711_v60 = vadd.f32 %v382_v58, %v3610_v61  ;;  %v2718_v47 = vor.u32 %v2869_v40, %v2715_v3  ;;  %v2642_v59 = vor.u32 %v2852_v49, %v2641_v6  ;;  %v2707_v6 = vld [vmem:[#allocation9 + $0xe8] sm:$0xf0] }
 0x10f   :  { %v3011_v1 = vpop.eup %3010  ;;  %v574_v4 = vadd.f32 2.0, %v542_v36  ;;  %v417_v5 = vmin.f32 %v3707_v38, 20.0  ;;  %v635_v8 = vmul.f32 %v3009_v63, %v539_v28  ;;  %v2643_v63 = vld [vmem:[#allocation9 + $0x68] sm:$0xf0] }
 0x110   :  { %v418_v9 = vmin.f32 %v3711_v60, 20.0  ;;  %v636_v11 = vmul.f32 %v3011_v1, %v540_v55  ;;  %3016 = vrcp.f32 %v573_v0  ;;  %1744 = vmatpush.bf16.msra.mxu1 %v2718_v47  ;;  %1598 = vmatpush.bf16.msrb.mxu2 %v2642_v59 }
 0x111   :  { %v3013_v12 = vpop.eup %3012  ;;  %v469_v16 = vmul.f32 1.442695, %v417_v5  ;;  %v667_v17 = vmul.f32 %v635_v8, %v3677_v42  ;;  %3018 = vrcp.f32 %v574_v4  ;;  %v2646_v4 = vor.u32 %v2851_v57, %v2643_v63  ;;  %v2849_v63 = vld [vmem:[#allocation9 + $0x54] sm:$0xf] }
 0x112   :  { %v3015_v19 = vpop.eup %3014  ;;  %v471_v20 = vmul.f32 1.442695, %v418_v9  ;;  %v668_v21 = vmul.f32 %v636_v11, %v3680_v43  ;;  %v511_v23 = vadd.f32 2.0, %v3013_v12 }
 0x113   :  { %3020 = vpow2.f32 %v469_v16  ;;  %v691_v22 = vpack.c.bf16 %v667_v17, %v665_v10  ;;  %v512_v24 = vadd.f32 2.0, %v3015_v19  ;;  %1696 = vmatpush.bf16.msra.mxu0 %v2646_v4 }
 0x114   :  { %3022 = vpow2.f32 %v471_v20  ;;  %v335_v14 = vpop.f32.mrf.mxu0  ;;  %v692_v25 = vpack.c.bf16 %v668_v21, %v666_v15  ;;  %v543_v26 = vmul.f32 %v3013_v12, %v511_v23 }
 0x115   :  { %v3720_v27 = vadd.f32 %v335_v14, %v3608_v53  ;;  %v384_v18 = vpop.f32.mrf.mxu1  ;;  %922 = vmatmul.bf16.gmra.mxu2 %v691_v22  ;;  %1020 = vmatmul.bf16.gmra.mxu0 %v691_v22  ;;  %v544_v42 = vmul.f32 %v3015_v19, %v512_v24 }
 0x116   :  { %v3723_v28 = vadd.f32 %v384_v18, %v3610_v61  ;;  %971 = vmatmul.bf16.gmra.mxu3 %v692_v25  ;;  %1069 = vmatmul.bf16.gmra.mxu1 %v692_v25  ;;  %v575_v43 = vadd.f32 2.0, %v543_v26  ;;  %v3017_v30 = vpop.eup %3016 }
 0x117   :  { %v419_v55 = vmin.f32 %v3720_v27, 20.0  ;;  %v576_v56 = vadd.f32 2.0, %v544_v42  ;;  %v3019_v32 = vpop.eup %3018  ;;  %v637_v41 = vmul.f32 %v3017_v30, %v3704_v48  ;;  %v2706_v48 = vor.u32 %v2868_v51, %v2705_v7  ;;  %v2850_v7 = vld [vmem:[#allocation9 + $0x54] sm:$0xf0]  ;;  %v2697_v51 = vld [vmem:[#allocation9 + $0xd0] sm:$0xf] }
 0x118   :  { %v420_v33 = vmin.f32 %v3723_v28, 20.0  ;;  %3024 = vrcp.f32 %v575_v43  ;;  %v638_v44 = vmul.f32 %v3019_v32, %v542_v36 }
 0x119   :  { %v3021_v34 = vpop.eup %3020  ;;  %v473_v35 = vmul.f32 1.442695, %v419_v55  ;;  %3026 = vrcp.f32 %v576_v56  ;;  %1647 = vmatpush.bf16.msrb.mxu3 %v2706_v48  ;;  %v669_v11 = vmul.f32 %v637_v41, %v3685_v62  ;;  %v2867_v41 = vld [vmem:[#allocation9 + $0xe4] sm:$0xf] }
 0x11a   :  { %v3023_v37 = vpop.eup %3022  ;;  %v513_v39 = vadd.f32 2.0, %v3021_v34  ;;  %v475_v50 = vmul.f32 1.442695, %v420_v33  ;;  %v670_v17 = vmul.f32 %v638_v44, %v3688_v2  ;;  %v2633_v44 = vld [vmem:[#allocation9 + $0x50] sm:$0xf]  ;;  %v2710_v49 = vor.u32 %v2867_v41, %v2707_v6 }
 0x11b   :  { %v514_v54 = vadd.f32 2.0, %v3023_v37  ;;  %3028 = vpow2.f32 %v473_v35  ;;  %v2634_v57 = vor.u32 %v2850_v7, %v2633_v44  ;;  %v2681_v7 = vld [vmem:[#allocation9 + $0xb0] sm:$0xf] }
 0x11c   :  { %v3728_v45 = vmul.f32 %v3021_v34, %v513_v39  ;;  %3030 = vpow2.f32 %v475_v50  ;;  %v338_v46 = vpop.f32.mrf.mxu0  ;;  %1745 = vmatpush.bf16.msra.mxu1 %v2710_v49 }
 0x11d   :  { %v546_v52 = vmul.f32 %v3023_v37, %v514_v54  ;;  %v3731_v13 = vadd.f32 %v338_v46, %v3608_v53  ;;  %v387_v58 = vpop.f32.mrf.mxu1  ;;  %1599 = vmatpush.bf16.msrb.mxu2 %v2634_v57 }
 0x11e   :  { %v3025_v0 = vpop.eup %3024  ;;  %v577_v36 = vadd.f32 2.0, %v3728_v45  ;;  %v3735_v1 = vadd.f32 %v387_v58, %v3610_v61  ;;  %v2866_v58 = vld [vmem:[#allocation9 + $0xd4] sm:$0xf0] }
 0x11f   :  { %v3027_v5 = vpop.eup %3026  ;;  %v578_v8 = vadd.f32 2.0, %v546_v52  ;;  %v421_v10 = vmin.f32 %v3731_v13, 20.0  ;;  %v639_v9 = vmul.f32 %v3025_v0, %v543_v26  ;;  %v2635_v0 = vld [vmem:[#allocation9 + $0x58] sm:$0xf0] }
 0x120   :  { %v422_v12 = vmin.f32 %v3735_v1, 20.0  ;;  %v640_v15 = vmul.f32 %v3027_v5, %v544_v42  ;;  %3032 = vrcp.f32 %v577_v36  ;;  %v2865_v36 = vld [vmem:[#allocation9 + $0xd4] sm:$0xf] }
 0x121   :  { %v3029_v16 = vpop.eup %3028  ;;  %v477_v19 = vmul.f32 1.442695, %v421_v10  ;;  %v671_v20 = vmul.f32 %v639_v9, %v3697_v29  ;;  %3034 = vrcp.f32 %v578_v8  ;;  %v2638_v9 = vor.u32 %v2849_v63, %v2635_v0  ;;  %v2619_v63 = vld [vmem:[#allocation9 + $0x38] sm:$0xf0] }
 0x122   :  { %v3031_v21 = vpop.eup %3030  ;;  %v479_v23 = vmul.f32 1.442695, %v422_v12  ;;  %v672_v22 = vmul.f32 %v640_v15, %v3700_v31  ;;  %v515_v24 = vadd.f32 2.0, %v3029_v16  ;;  %v2625_v12 = vld [vmem:[#allocation9 + $0x40] sm:$0xf] }
 0x123   :  { %3036 = vpow2.f32 %v477_v19  ;;  %v693_v14 = vpack.c.bf16 %v671_v20, %v669_v11  ;;  %v516_v62 = vadd.f32 2.0, %v3031_v21  ;;  %v2699_v11 = vld [vmem:[#allocation9 + $0xd8] sm:$0xf0]  ;;  %1697 = vmatpush.bf16.msra.mxu0 %v2638_v9 }
 0x124   :  { %3038 = vpow2.f32 %v479_v23  ;;  %v340_v25 = vpop.f32.mrf.mxu0  ;;  %v694_v26 = vpack.c.bf16 %v672_v22, %v670_v17  ;;  %v547_v18 = vmul.f32 %v3029_v16, %v515_v24  ;;  %v2702_v20 = vor.u32 %v2865_v36, %v2699_v11 }
 0x125   :  { %v3744_v42 = vadd.f32 %v340_v25, %v3608_v53  ;;  %v389_v2 = vpop.f32.mrf.mxu1  ;;  %927 = vmatmul.bf16.gmra.mxu2 %v693_v14  ;;  %1025 = vmatmul.bf16.gmra.mxu0 %v693_v14  ;;  %v548_v29 = vmul.f32 %v3031_v21, %v516_v62  ;;  %v2848_v21 = vld [vmem:[#allocation9 + $0x44] sm:$0xf0]  ;;  %v2847_v25 = vld [vmem:[#allocation9 + $0x44] sm:$0xf] }
 0x126   :  { %v3747_v43 = vadd.f32 %v389_v2, %v3610_v61  ;;  %976 = vmatmul.bf16.gmra.mxu3 %v694_v26  ;;  %1074 = vmatmul.bf16.gmra.mxu1 %v694_v26  ;;  %v579_v31 = vadd.f32 2.0, %v547_v18  ;;  %v3033_v30 = vpop.eup %3032  ;;  %v2626_v14 = vor.u32 %v2848_v21, %v2625_v12  ;;  %v2864_v62 = vld [vmem:[#allocation9 + $0xc4] sm:$0xf0] }
 0x127   :  { %v423_v55 = vmin.f32 %v3744_v42, 20.0  ;;  %v580_v56 = vadd.f32 2.0, %v548_v29  ;;  %v3035_v32 = vpop.eup %3034  ;;  %v641_v39 = vmul.f32 %v3033_v30, %v3728_v45  ;;  %v2863_v30 = vld [vmem:[#allocation9 + $0xc4] sm:$0xf]  ;;  %1746 = vmatpush.bf16.msra.mxu1 %v2702_v20 }
 0x128   :  { %v424_v33 = vmin.f32 %v3747_v43, 20.0  ;;  %3040 = vrcp.f32 %v579_v31  ;;  %v642_v54 = vmul.f32 %v3035_v32, %v546_v52  ;;  %v2698_v52 = vor.u32 %v2866_v58, %v2697_v51  ;;  %1600 = vmatpush.bf16.msrb.mxu2 %v2626_v14  ;;  %v2862_v51 = vld [vmem:[#allocation9 + $0xb4] sm:$0xf0] }
 0x129   :  { %v3037_v34 = vpop.eup %3036  ;;  %v481_v35 = vmul.f32 1.442695, %v423_v55  ;;  %3042 = vrcp.f32 %v580_v56  ;;  %v673_v5 = vmul.f32 %v641_v39, %v3707_v38  ;;  %v2689_v38 = vld [vmem:[#allocation9 + $0xc0] sm:$0xf] }
 0x12a   :  { %v3039_v37 = vpop.eup %3038  ;;  %v517_v50 = vadd.f32 2.0, %v3037_v34  ;;  %v483_v40 = vmul.f32 1.442695, %v424_v33  ;;  %v674_v16 = vmul.f32 %v642_v54, %v3711_v60  ;;  %1648 = vmatpush.bf16.msrb.mxu3 %v2698_v52  ;;  %v2690_v31 = vor.u32 %v2864_v62, %v2689_v38  ;;  %v2845_v52 = vld [vmem:[#allocation9 + $0x34] sm:$0xf] }
 0x12b   :  { %v518_v3 = vadd.f32 2.0, %v3039_v37  ;;  %3044 = vpow2.f32 %v481_v35  ;;  %v2622_v36 = vor.u32 %v2845_v52, %v2619_v63 }
 0x12c   :  { %v3752_v46 = vmul.f32 %v3037_v34, %v517_v50  ;;  %3046 = vpow2.f32 %v483_v40  ;;  %v343_v47 = vpop.f32.mrf.mxu0  ;;  %v2617_v50 = vld [vmem:[#allocation9 + $0x30] sm:$0xf]  ;;  %v2846_v40 = vld [vmem:[#allocation9 + $0x34] sm:$0xf0] }
 0x12d   :  { %v3754_v59 = vmul.f32 %v3039_v37, %v518_v3  ;;  %v3757_v45 = vadd.f32 %v343_v47, %v3608_v53  ;;  %v392_v48 = vpop.f32.mrf.mxu1  ;;  %v2618_v3 = vor.u32 %v2846_v40, %v2617_v50 }
 0x12e   :  { %v3041_v4 = vpop.eup %3040  ;;  %v581_v8 = vadd.f32 2.0, %v3752_v46  ;;  %v3762_v10 = vadd.f32 %v392_v48, %v3610_v61  ;;  %1649 = vmatpush.bf16.msrb.mxu3 %v2690_v31 }
 0x12f   :  { %v3043_v15 = vpop.eup %3042  ;;  %v425_v17 = vmin.f32 %v3757_v45, 20.0  ;;  %v643_v19 = vmul.f32 %v3041_v4, %v547_v18  ;;  %v582_v23 = vadd.f32 2.0, %v3754_v59  ;;  %v2627_v18 = vld [vmem:[#allocation9 + $0x48] sm:$0xf0]  ;;  %1601 = vmatpush.bf16.msrb.mxu2 %v2618_v3  ;;  %v2683_v4 = vld [vmem:[#allocation9 + $0xb8] sm:$0xf0] }
 0x130   :  { %v426_v22 = vmin.f32 %v3762_v10, 20.0  ;;  %v644_v24 = vmul.f32 %v3043_v15, %v548_v29  ;;  %3048 = vrcp.f32 %v581_v8  ;;  %v2630_v34 = vor.u32 %v2847_v25, %v2627_v18  ;;  %v2691_v29 = vld [vmem:[#allocation9 + $0xc8] sm:$0xf0] }
 0x131   :  { %v3045_v26 = vpop.eup %3044  ;;  %v485_v60 = vmul.f32 1.442695, %v425_v17  ;;  %v675_v2 = vmul.f32 %v643_v19, %v3720_v27  ;;  %v2694_v39 = vor.u32 %v2863_v30, %v2691_v29 }
 0x132   :  { %v3047_v55 = vpop.eup %3046  ;;  %v487_v56 = vmul.f32 1.442695, %v426_v22  ;;  %v676_v32 = vmul.f32 %v644_v24, %v3723_v28  ;;  %v519_v33 = vadd.f32 2.0, %v3045_v26  ;;  %1698 = vmatpush.bf16.msra.mxu0 %v2630_v34 }
 0x133   :  { %3050 = vpow2.f32 %v485_v60  ;;  %v695_v35 = vpack.c.bf16 %v675_v2, %v673_v5  ;;  %v520_v37 = vadd.f32 2.0, %v3047_v55  ;;  %1747 = vmatpush.bf16.msra.mxu1 %v2694_v39 }
 0x134   :  { %3052 = vpow2.f32 %v487_v56  ;;  %v345_v27 = vpop.f32.mrf.mxu0  ;;  %v696_v41 = vpack.c.bf16 %v676_v32, %v674_v16  ;;  %v551_v54 = vmul.f32 %v3045_v26, %v519_v33 }
 0x135   :  { %3054 = vrcp.f32 %v582_v23  ;;  %v3771_v28 = vadd.f32 %v345_v27, %v3608_v53  ;;  %v394_v6 = vpop.f32.mrf.mxu1  ;;  %932 = vmatmul.bf16.gmra.mxu2 %v695_v35  ;;  %1030 = vmatmul.bf16.gmra.mxu0 %v695_v35  ;;  %v552_v44 = vmul.f32 %v3047_v55, %v520_v37  ;;  %v2682_v53 = vor.u32 %v2862_v51, %v2681_v7  ;;  %v2673_v7 = vld [vmem:[#allocation9 + $0xa0] sm:$0xf]  ;;  %v2860_v51 = vld [vmem:[#allocation9 + $0xa4] sm:$0xf0] }
 0x136   :  { %v3774_v47 = vadd.f32 %v394_v6, %v3610_v61  ;;  %981 = vmatmul.bf16.gmra.mxu3 %v696_v41  ;;  %1079 = vmatmul.bf16.gmra.mxu1 %v696_v41  ;;  %v583_v49 = vadd.f32 2.0, %v551_v54  ;;  %v3049_v58 = vpop.eup %3048  ;;  %v2861_v61 = vld [vmem:[#allocation9 + $0xb4] sm:$0xf] }
 0x137   :  { %v427_v48 = vmin.f32 %v3771_v28, 20.0  ;;  %v584_v57 = vadd.f32 2.0, %v552_v44  ;;  %1650 = vmatpush.bf16.msrb.mxu3 %v2682_v53  ;;  %v2686_v9 = vor.u32 %v2861_v61, %v2683_v4  ;;  %1699 = vmatpush.bf16.msra.mxu0 %v2622_v36  ;;  %v645_v20 = vmul.f32 %v3049_v58, %v3752_v46  ;;  %v2859_v58 = vld [vmem:[#allocation9 + $0xa4] sm:$0xf]  ;;  %v2858_v36 = vld [vmem:[#allocation9 + $0x94] sm:$0xf0] }
 0x138   :  { %v428_v0 = vmin.f32 %v3774_v47, 20.0  ;;  %3056 = vrcp.f32 %v583_v49  ;;  %v2857_v61 = vld [vmem:[#allocation9 + $0x94] sm:$0xf] }
 0x139   :  { %v3051_v5 = vpop.eup %3050  ;;  %v489_v8 = vmul.f32 1.442695, %v427_v48  ;;  %3058 = vrcp.f32 %v584_v57  ;;  %1748 = vmatpush.bf16.msra.mxu1 %v2686_v9  ;;  %v677_v26 = vmul.f32 %v645_v20, %v3731_v13  ;;  %v2609_v48 = vld [vmem:[#allocation9 + $0x20] sm:$0xf]  ;;  %v2674_v57 = vor.u32 %v2860_v51, %v2673_v7  ;;  %v2667_v9 = vld [vmem:[#allocation9 + $0x98] sm:$0xf0] }
 0x13a   :  { %v3053_v11 = vpop.eup %3052  ;;  %v521_v12 = vadd.f32 2.0, %v3051_v5  ;;  %v491_v15 = vmul.f32 1.442695, %v428_v0  ;;  %v2665_v0 = vld [vmem:[#allocation9 + $0x90] sm:$0xf] }
 0x13b   :  { %v3055_v16 = vpop.eup %3054  ;;  %v522_v17 = vadd.f32 2.0, %v3053_v11  ;;  %3060 = vpow2.f32 %v489_v8  ;;  %1651 = vmatpush.bf16.msrb.mxu3 %v2674_v57  ;;  %v2666_v8 = vor.u32 %v2858_v36, %v2665_v0  ;;  %v2657_v20 = vld [vmem:[#allocation9 + $0x80] sm:$0xf] }
 0x13c   :  { %v553_v19 = vmul.f32 %v3051_v5, %v521_v12  ;;  %3062 = vpow2.f32 %v491_v15  ;;  %v646_v23 = vmul.f32 %v3055_v16, %v3754_v59  ;;  %v2611_v12 = vld [vmem:[#allocation9 + $0x28] sm:$0xf0]  ;;  %v2670_v15 = vor.u32 %v2857_v61, %v2667_v9 }
 0x13d   :  { %v554_v21 = vmul.f32 %v3053_v11, %v522_v17  ;;  %v2843_v11 = vld [vmem:[#allocation9 + $0x24] sm:$0xf] }
 0x13e   :  { %v3057_v38 = vpop.eup %3056  ;;  %v585_v14 = vadd.f32 2.0, %v553_v19  ;;  %v678_v18 = vmul.f32 %v646_v23, %v3735_v1  ;;  %v2614_v17 = vor.u32 %v2843_v11, %v2611_v12 }
 0x13f   :  { %v3059_v22 = vpop.eup %3058  ;;  %v647_v24 = vmul.f32 %v3057_v38, %v551_v54  ;;  %v586_v60 = vadd.f32 2.0, %v554_v21  ;;  %1652 = vmatpush.bf16.msrb.mxu3 %v2666_v8  ;;  %v2855_v38 = vld [vmem:[#allocation9 + $0x84] sm:$0xf] }
 0x140   :  { %v648_v62 = vmul.f32 %v3059_v22, %v552_v44  ;;  %3064 = vrcp.f32 %v585_v14  ;;  %v733_v44 = vld [vmem:[#allocation7] sm:$0x3]  ;;  %1700 = vmatpush.bf16.msra.mxu0 %v2614_v17 }
 0x141   :  { %v3061_v25 = vpop.eup %3060  ;;  %v679_v2 = vmul.f32 %v647_v24, %v3744_v42  ;;  %3066 = vrcp.f32 %v586_v60  ;;  %v3788_v49 = vperm.slane %v733_v44, 1  ;;  %v3793_v5 = vperm.slane %v733_v44, 0  ;;  %v2842_v60 = vld [vmem:[#allocation9 + $0x14] sm:$0xf0] }
 0x142   :  { %v3063_v31 = vpop.eup %3062  ;;  %v680_v30 = vmul.f32 %v648_v62, %v3747_v43  ;;  %v523_v46 = vadd.f32 2.0, %v3061_v25  ;;  %v2659_v62 = vld [vmem:[#allocation9 + $0x88] sm:$0xf0] }
 0x143   :  { %v697_v55 = vpack.c.bf16 %v679_v2, %v677_v26  ;;  %v524_v56 = vadd.f32 2.0, %v3063_v31  ;;  %v2601_v26 = vld [vmem:[#allocation9 + $0x10] sm:$0xf]  ;;  %v2841_v2 = vld [vmem:[#allocation9 + $0x14] sm:$0xf] }
 0x144   :  { %v698_v59 = vpack.c.bf16 %v680_v30, %v678_v18  ;;  %v555_v32 = vmul.f32 %v3061_v25, %v523_v46 }
 0x145   :  { %937 = vmatmul.bf16.gmra.mxu2 %v697_v55  ;;  %1035 = vmatmul.bf16.gmra.mxu0 %v697_v55  ;;  %v556_v33 = vmul.f32 %v3063_v31, %v524_v56  ;;  %v2662_v31 = vor.u32 %v2855_v38, %v2659_v62  ;;  %v2602_v55 = vor.u32 %v2842_v60, %v2601_v26  ;;  %v2603_v56 = vld [vmem:[#allocation9 + $0x18] sm:$0xf0] }
 0x146   :  { %986 = vmatmul.bf16.gmra.mxu3 %v698_v59  ;;  %1084 = vmatmul.bf16.gmra.mxu1 %v698_v59  ;;  %v587_v13 = vadd.f32 2.0, %v555_v32  ;;  %v3065_v42 = vpop.eup %3064  ;;  %v2606_v59 = vor.u32 %v2841_v2, %v2603_v56 }
 0x147   :  { %v588_v34 = vadd.f32 2.0, %v556_v33  ;;  %v3067_v1 = vpop.eup %3066  ;;  %v649_v29 = vmul.f32 %v3065_v42, %v553_v19  ;;  %v2839_v42 = vld [vmem:[#allocation9 + $0x4] sm:$0xf] }
 0x148   :  { %3068 = vrcp.f32 %v587_v13  ;;  %v650_v35 = vmul.f32 %v3067_v1, %v554_v21  ;;  %v2856_v21 = vld [vmem:[#allocation9 + $0x84] sm:$0xf0]  ;;  %1701 = vmatpush.bf16.msra.mxu0 %v2606_v59  ;;  %v2593_v13 = vld [vmem:[#allocation9] sm:$0xf] }
 0x149   :  { %3070 = vrcp.f32 %v588_v34  ;;  %v681_v40 = vmul.f32 %v649_v29, %v3757_v45  ;;  %v2844_v45 = vld [vmem:[#allocation9 + $0x24] sm:$0xf0]  ;;  %v2658_v14 = vor.u32 %v2856_v21, %v2657_v20 }
 0x14a   :  { %v682_v41 = vmul.f32 %v650_v35, %v3762_v10  ;;  %v2610_v10 = vor.u32 %v2844_v45, %v2609_v48  ;;  %v2840_v34 = vld [vmem:[#allocation9 + $0x4] sm:$0xf0]  ;;  %v2595_v35 = vld [vmem:[#allocation9 + $0x8] sm:$0xf0] }
 0x14b   :  { %1653 = vmatpush.bf16.msrb.mxu3 %v2658_v14 }
 0x14c   :  { %1602 = vmatpush.bf16.msrb.mxu2 %v2610_v10 }
 0x14e   :  { %v3069_v43 = vpop.eup %3068 }
 0x14f   :  { %v3071_v37 = vpop.eup %3070  ;;  %v651_v39 = vmul.f32 %v3069_v43, %v555_v32  ;;  %v2594_v43 = vor.u32 %v2840_v34, %v2593_v13 }
 0x150   :  { %v652_v50 = vmul.f32 %v3071_v37, %v556_v33  ;;  %1603 = vmatpush.bf16.msrb.mxu2 %v2602_v55 }
 0x151   :  { %v683_v27 = vmul.f32 %v651_v39, %v3771_v28  ;;  %v2675_v28 = vld [vmem:[#allocation9 + $0xa8] sm:$0xf0]  ;;  %v2598_v39 = vor.u32 %v2839_v42, %v2595_v35 }
 0x152   :  { %v684_v54 = vmul.f32 %v652_v50, %v3774_v47  ;;  %v2678_v52 = vor.u32 %v2859_v58, %v2675_v28 }
 0x153   :  { %v699_v3 = vpack.c.bf16 %v683_v27, %v681_v40  ;;  %1702 = vmatpush.bf16.msra.mxu0 %v2598_v39 }
 0x154   :  { %v700_v6 = vpack.c.bf16 %v684_v54, %v682_v41  ;;  %1749 = vmatpush.bf16.msra.mxu1 %v2678_v52  ;;  %1604 = vmatpush.bf16.msrb.mxu2 %v2594_v43 }
 0x155   :  { %942 = vmatmul.bf16.gmra.mxu2 %v699_v3  ;;  %1040 = vmatmul.bf16.gmra.mxu0 %v699_v3 }
 0x156   :  { %991 = vmatmul.bf16.gmra.mxu3 %v700_v6  ;;  %1089 = vmatmul.bf16.gmra.mxu1 %v700_v6 }
 0x158   :  { %1750 = vmatpush.bf16.msra.mxu1 %v2670_v15 }
 0x15c   :  { %1751 = vmatpush.bf16.msra.mxu1 %v2662_v31 }
 0x162   :  { %v1006_v53 = vpop.f32.mrf.mxu0 }
 0x163   :  { %v1007_v47 = vadd.f32 %v1006_v53, %v3788_v49  ;;  %v1055_v63 = vpop.f32.mrf.mxu1 }
 0x165   :  { %v3791_v4 = vadd.f32 %v1055_v63, %v1007_v47 }
 0x167   :  { %v1096_v16 = vmin.f32 %v3791_v4, 20.0 }
 0x168   :  { %v908_v19 = vpop.f32.mrf.mxu2 }
 0x169   :  { %v1129_v23 = vmul.f32 1.442695, %v1096_v16  ;;  %v909_v22 = vadd.f32 %v908_v19, %v3793_v5  ;;  %v957_v24 = vpop.f32.mrf.mxu3 }
 0x16a   :  { %v1008_v25 = vpop.f32.mrf.mxu0 }
 0x16b   :  { %3072 = vpow2.f32 %v1129_v23  ;;  %v3797_v18 = vadd.f32 %v957_v24, %v909_v22  ;;  %v1009_v30 = vadd.f32 %v1008_v25, %v3788_v49  ;;  %v1057_v46 = vpop.f32.mrf.mxu1 }
 0x16d   :  { %v1095_v32 = vmin.f32 %v3797_v18, 20.0  ;;  %v3801_v33 = vadd.f32 %v1057_v46, %v1009_v30 }
 0x16f   :  { %v1127_v1 = vmul.f32 1.442695, %v1095_v32  ;;  %v1098_v29 = vmin.f32 %v3801_v33, 20.0 }
 0x170   :  { %v910_v37 = vpop.f32.mrf.mxu2 }
 0x171   :  { %v3073_v50 = vpop.eup %3072  ;;  %3074 = vpow2.f32 %v1127_v1  ;;  %v1133_v40 = vmul.f32 1.442695, %v1098_v29  ;;  %v911_v27 = vadd.f32 %v910_v37, %v3793_v5  ;;  %v959_v41 = vpop.f32.mrf.mxu3 }
 0x172   :  { %v1192_v54 = vadd.f32 2.0, %v3073_v50  ;;  %v1011_v3 = vpop.f32.mrf.mxu0 }
 0x173   :  { %3076 = vpow2.f32 %v1133_v40  ;;  %v3805_v6 = vadd.f32 %v959_v41, %v911_v27  ;;  %v1012_v44 = vadd.f32 %v1011_v3, %v3788_v49  ;;  %v1060_v7 = vpop.f32.mrf.mxu1 }
 0x174   :  { %v1224_v51 = vmul.f32 %v3073_v50, %v1192_v54 }
 0x175   :  { %v1097_v58 = vmin.f32 %v3805_v6, 20.0  ;;  %v3809_v48 = vadd.f32 %v1060_v7, %v1012_v44 }
 0x176   :  { %v1256_v45 = vadd.f32 2.0, %v1224_v51 }
 0x177   :  { %v3075_v57 = vpop.eup %3074  ;;  %v1131_v28 = vmul.f32 1.442695, %v1097_v58  ;;  %v1100_v53 = vmin.f32 %v3809_v48, 20.0 }
 0x178   :  { %v1191_v10 = vadd.f32 2.0, %v3075_v57  ;;  %v913_v52 = vpop.f32.mrf.mxu2 }
 0x179   :  { %v3077_v47 = vpop.eup %3076  ;;  %3078 = vpow2.f32 %v1131_v28  ;;  %v1137_v63 = vmul.f32 1.442695, %v1100_v53  ;;  %v914_v0 = vadd.f32 %v913_v52, %v3793_v5  ;;  %v962_v36 = vpop.f32.mrf.mxu3 }
 0x17a   :  { %3080 = vrcp.f32 %v1256_v45  ;;  %v3813_v61 = vmul.f32 %v3075_v57, %v1191_v10  ;;  %v1194_v8 = vadd.f32 2.0, %v3077_v47  ;;  %v1013_v9 = vpop.f32.mrf.mxu0 }
 0x17b   :  { %3082 = vpow2.f32 %v1137_v63  ;;  %v3815_v11 = vadd.f32 %v962_v36, %v914_v0  ;;  %v1014_v12 = vadd.f32 %v1013_v9, %v3788_v49  ;;  %v1062_v15 = vpop.f32.mrf.mxu1 }
 0x17c   :  { %v1226_v16 = vmul.f32 %v3077_v47, %v1194_v8  ;;  %v1255_v20 = vadd.f32 2.0, %v3813_v61 }
 0x17d   :  { %v1099_v17 = vmin.f32 %v3815_v11, 20.0  ;;  %v3819_v19 = vadd.f32 %v1062_v15, %v1014_v12 }
 0x17e   :  { %v1258_v21 = vadd.f32 2.0, %v1226_v16 }
 0x17f   :  { %v3079_v38 = vpop.eup %3078  ;;  %v1135_v23 = vmul.f32 1.442695, %v1099_v17  ;;  %v1102_v22 = vmin.f32 %v3819_v19, 20.0 }
 0x180   :  { %v3081_v24 = vpop.eup %3080  ;;  %3084 = vrcp.f32 %v1258_v21  ;;  %v1193_v14 = vadd.f32 2.0, %v3079_v38  ;;  %v915_v62 = vpop.f32.mrf.mxu2 }
 0x181   :  { %v3083_v25 = vpop.eup %3082  ;;  %3086 = vpow2.f32 %v1135_v23  ;;  %v1141_v26 = vmul.f32 1.442695, %v1102_v22  ;;  %v916_v60 = vadd.f32 %v915_v62, %v3793_v5  ;;  %v964_v2 = vpop.f32.mrf.mxu3  ;;  %v1320_v32 = vmul.f32 %v3081_v24, %v1224_v51 }
 0x182   :  { %3088 = vrcp.f32 %v1255_v20  ;;  %v1225_v31 = vmul.f32 %v3079_v38, %v1193_v14  ;;  %v1196_v30 = vadd.f32 2.0, %v3083_v25  ;;  %v1016_v46 = vpop.f32.mrf.mxu0 }
 0x183   :  { %3090 = vpow2.f32 %v1141_v26  ;;  %v3824_v55 = vadd.f32 %v964_v2, %v916_v60  ;;  %v1017_v56 = vadd.f32 %v1016_v46, %v3788_v49  ;;  %v1065_v59 = vpop.f32.mrf.mxu1  ;;  %v1352_v27 = vmul.f32 %v1320_v32, %v3791_v4 }
 0x184   :  { %v1257_v13 = vadd.f32 2.0, %v1225_v31  ;;  %v1228_v34 = vmul.f32 %v3083_v25, %v1196_v30 }
 0x185   :  { %v1101_v42 = vmin.f32 %v3824_v55, 20.0  ;;  %v3828_v1 = vadd.f32 %v1065_v59, %v1017_v56 }
 0x186   :  { %v3085_v29 = vpop.eup %3084  ;;  %3092 = vrcp.f32 %v1257_v13  ;;  %v1260_v43 = vadd.f32 2.0, %v1228_v34 }
 0x187   :  { %v3087_v35 = vpop.eup %3086  ;;  %v1322_v37 = vmul.f32 %v3085_v29, %v1226_v16  ;;  %v1139_v39 = vmul.f32 1.442695, %v1101_v42  ;;  %v1104_v50 = vmin.f32 %v3828_v1, 20.0 }
 0x188   :  { %v3089_v40 = vpop.eup %3088  ;;  %v1195_v41 = vadd.f32 2.0, %v3087_v35  ;;  %v918_v54 = vpop.f32.mrf.mxu2 }
 0x189   :  { %v3091_v3 = vpop.eup %3090  ;;  %v1354_v44 = vmul.f32 %v1322_v37, %v3801_v33  ;;  %3094 = vpow2.f32 %v1139_v39  ;;  %v1145_v7 = vmul.f32 1.442695, %v1104_v50  ;;  %v919_v51 = vadd.f32 %v918_v54, %v3793_v5  ;;  %v967_v58 = vpop.f32.mrf.mxu3 }
 0x18a   :  { %3096 = vrcp.f32 %v1260_v43  ;;  %v3834_v45 = vmul.f32 %v3087_v35, %v1195_v41  ;;  %v1018_v57 = vpop.f32.mrf.mxu0  ;;  %v1198_v28 = vadd.f32 2.0, %v3091_v3  ;;  %v1319_v33 = vmul.f32 %v3089_v40, %v3813_v61 }
 0x18b   :  { %3098 = vpow2.f32 %v1145_v7  ;;  %v3836_v53 = vadd.f32 %v967_v58, %v919_v51  ;;  %v1019_v4 = vadd.f32 %v1018_v57, %v3788_v49  ;;  %v1067_v10 = vpop.f32.mrf.mxu1  ;;  %v1384_v52 = vpack.c.bf16 %v1354_v44, %v1352_v27 }
 0x18c   :  { %v3093_v47 = vpop.eup %3092  ;;  %v1230_v63 = vmul.f32 %v3091_v3, %v1198_v28  ;;  %v1259_v9 = vadd.f32 2.0, %v3834_v45  ;;  %v1351_v61 = vmul.f32 %v1319_v33, %v3797_v18 }
 0x18d   :  { %v1321_v0 = vmul.f32 %v3093_v47, %v1225_v31  ;;  %v1103_v36 = vmin.f32 %v3836_v53, 20.0  ;;  %v3841_v8 = vadd.f32 %v1067_v10, %v1019_v4  ;;  %1654 = vmatmul.bf16.vlgmr.msrb.gmra.mxu3 %v1384_v52  ;;  %1752 = vmatmul.bf16.vlgmr.msra.gmra.mxu1 %v1384_v52 }
 0x18e   :  { %v1262_v12 = vadd.f32 2.0, %v1230_v63 }
 0x18f   :  { %v3095_v15 = vpop.eup %3094  ;;  %v1353_v16 = vmul.f32 %v1321_v0, %v3805_v6  ;;  %v1143_v17 = vmul.f32 1.442695, %v1103_v36  ;;  %v1106_v20 = vmin.f32 %v3841_v8, 20.0 }
 0x190   :  { %v3097_v21 = vpop.eup %3096  ;;  %v920_v38 = vpop.f32.mrf.mxu2  ;;  %3100 = vrcp.f32 %v1262_v12  ;;  %v1197_v23 = vadd.f32 2.0, %v3095_v15 }
 0x191   :  { %v3099_v22 = vpop.eup %3098  ;;  %3102 = vpow2.f32 %v1143_v17  ;;  %v1149_v24 = vmul.f32 1.442695, %v1106_v20  ;;  %v921_v14 = vadd.f32 %v920_v38, %v3793_v5  ;;  %v969_v62 = vpop.f32.mrf.mxu3  ;;  %v1383_v60 = vpack.c.bf16 %v1353_v16, %v1351_v61 }
 0x192   :  { %3104 = vrcp.f32 %v1259_v9  ;;  %v1200_v25 = vadd.f32 2.0, %v3099_v22  ;;  %v1021_v26 = vpop.f32.mrf.mxu0  ;;  %v1229_v6 = vmul.f32 %v3095_v15, %v1197_v23  ;;  %v1324_v30 = vmul.f32 %v3097_v21, %v1228_v34 }
 0x193   :  { %3106 = vpow2.f32 %v1149_v24  ;;  %v3848_v2 = vadd.f32 %v969_v62, %v921_v14  ;;  %v1022_v31 = vadd.f32 %v1021_v26, %v3788_v49  ;;  %v1070_v18 = vpop.f32.mrf.mxu1  ;;  %1605 = vmatmul.bf16.vlgmr.msrb.gmra.mxu2 %v1383_v60  ;;  %1703 = vmatmul.bf16.vlgmr.msra.gmra.mxu0 %v1383_v60 }
 0x194   :  { %v3851_v46 = vmul.f32 %v3099_v22, %v1200_v25  ;;  %v1261_v56 = vadd.f32 2.0, %v1229_v6  ;;  %v1356_v34 = vmul.f32 %v1324_v30, %v3809_v48 }
 0x195   :  { %v1105_v59 = vmin.f32 %v3848_v2, 20.0  ;;  %v3854_v32 = vadd.f32 %v1070_v18, %v1022_v31 }
 0x196   :  { %v3101_v13 = vpop.eup %3100  ;;  %v1264_v42 = vadd.f32 2.0, %v3851_v46  ;;  %3108 = vrcp.f32 %v1261_v56 }
 0x197   :  { %v3103_v29 = vpop.eup %3102  ;;  %v1147_v43 = vmul.f32 1.442695, %v1105_v59  ;;  %v1108_v35 = vmin.f32 %v3854_v32, 20.0  ;;  %v1326_v37 = vmul.f32 %v3101_v13, %v1230_v63 }
 0x198   :  { %v3105_v39 = vpop.eup %3104  ;;  %v1199_v50 = vadd.f32 2.0, %v3103_v29  ;;  %v923_v40 = vpop.f32.mrf.mxu2 }
 0x199   :  { %v3107_v27 = vpop.eup %3106  ;;  %3110 = vpow2.f32 %v1147_v43  ;;  %v1153_v41 = vmul.f32 1.442695, %v1108_v35  ;;  %v924_v54 = vadd.f32 %v923_v40, %v3793_v5  ;;  %v972_v3 = vpop.f32.mrf.mxu3  ;;  %v1358_v44 = vmul.f32 %v1326_v37, %v3819_v19 }
 0x19a   :  { %3112 = vrcp.f32 %v1264_v42  ;;  %v3861_v7 = vmul.f32 %v3103_v29, %v1199_v50  ;;  %v1023_v51 = vpop.f32.mrf.mxu0  ;;  %v1202_v58 = vadd.f32 2.0, %v3107_v27  ;;  %v1323_v52 = vmul.f32 %v3105_v39, %v3834_v45 }
 0x19b   :  { %3114 = vpow2.f32 %v1153_v41  ;;  %v3863_v57 = vadd.f32 %v972_v3, %v924_v54  ;;  %v1024_v48 = vadd.f32 %v1023_v51, %v3788_v49  ;;  %v1072_v28 = vpop.f32.mrf.mxu1  ;;  %v1386_v4 = vpack.c.bf16 %v1358_v44, %v1356_v34 }
 0x19c   :  { %v3109_v10 = vpop.eup %3108  ;;  %v1234_v47 = vmul.f32 %v3107_v27, %v1202_v58  ;;  %v1263_v0 = vadd.f32 2.0, %v3861_v7  ;;  %v1355_v45 = vmul.f32 %v1323_v52, %v3815_v11 }
 0x19d   :  { %v1107_v33 = vmin.f32 %v3863_v57, 20.0  ;;  %v3868_v63 = vadd.f32 %v1072_v28, %v1024_v48  ;;  %1659 = vmatmul.bf16.gmra.mxu3 %v1386_v4  ;;  %1757 = vmatmul.bf16.gmra.mxu1 %v1386_v4  ;;  %v1325_v19 = vmul.f32 %v3109_v10, %v1229_v6 }
 0x19e   :  { %v1266_v36 = vadd.f32 2.0, %v1234_v47 }
 0x19f   :  { %v3111_v9 = vpop.eup %3110  ;;  %v1151_v12 = vmul.f32 1.442695, %v1107_v33  ;;  %v1110_v15 = vmin.f32 %v3868_v63, 20.0  ;;  %v1357_v16 = vmul.f32 %v1325_v19, %v3824_v55 }
 0x1a0   :  { %v3113_v17 = vpop.eup %3112  ;;  %v925_v20 = vpop.f32.mrf.mxu2  ;;  %3116 = vrcp.f32 %v1266_v36  ;;  %v1201_v21 = vadd.f32 2.0, %v3111_v9 }
 0x1a1   :  { %v3115_v61 = vpop.eup %3114  ;;  %3118 = vpow2.f32 %v1151_v12  ;;  %v1157_v38 = vmul.f32 1.442695, %v1110_v15  ;;  %v926_v23 = vadd.f32 %v925_v20, %v3793_v5  ;;  %v974_v22 = vpop.f32.mrf.mxu3  ;;  %v1385_v62 = vpack.c.bf16 %v1357_v16, %v1355_v45 }
 0x1a2   :  { %3120 = vrcp.f32 %v1263_v0  ;;  %v1204_v24 = vadd.f32 2.0, %v3115_v61  ;;  %v1026_v14 = vpop.f32.mrf.mxu0  ;;  %v1233_v25 = vmul.f32 %v3111_v9, %v1201_v21  ;;  %v1328_v60 = vmul.f32 %v3113_v17, %v3851_v46 }
 0x1a3   :  { %3122 = vpow2.f32 %v1157_v38  ;;  %v3875_v26 = vadd.f32 %v974_v22, %v926_v23  ;;  %v1027_v55 = vadd.f32 %v1026_v14, %v3788_v49  ;;  %v1075_v11 = vpop.f32.mrf.mxu1  ;;  %1610 = vmatmul.bf16.gmra.mxu2 %v1385_v62  ;;  %1708 = vmatmul.bf16.gmra.mxu0 %v1385_v62 }
 0x1a4   :  { %v3879_v6 = vmul.f32 %v3115_v61, %v1204_v24  ;;  %v1265_v31 = vadd.f32 2.0, %v1233_v25  ;;  %v1360_v46 = vmul.f32 %v1328_v60, %v3828_v1 }
 0x1a5   :  { %v1109_v18 = vmin.f32 %v3875_v26, 20.0  ;;  %v3882_v30 = vadd.f32 %v1075_v11, %v1027_v55 }
 0x1a6   :  { %v3117_v56 = vpop.eup %3116  ;;  %v1268_v59 = vadd.f32 2.0, %v3879_v6  ;;  %3124 = vrcp.f32 %v1265_v31 }
 0x1a7   :  { %v3119_v13 = vpop.eup %3118  ;;  %v1155_v42 = vmul.f32 1.442695, %v1109_v18  ;;  %v1112_v29 = vmin.f32 %v3882_v30, 20.0  ;;  %v1330_v43 = vmul.f32 %v3117_v56, %v1234_v47 }
 0x1a8   :  { %v3121_v35 = vpop.eup %3120  ;;  %v1203_v37 = vadd.f32 2.0, %v3119_v13  ;;  %v928_v39 = vpop.f32.mrf.mxu2 }
 0x1a9   :  { %v3123_v34 = vpop.eup %3122  ;;  %3126 = vpow2.f32 %v1155_v42  ;;  %v1161_v50 = vmul.f32 1.442695, %v1112_v29  ;;  %v929_v40 = vadd.f32 %v928_v39, %v3793_v5  ;;  %v977_v27 = vpop.f32.mrf.mxu3  ;;  %v1362_v41 = vmul.f32 %v1330_v43, %v3841_v8 }
 0x1aa   :  { %3128 = vrcp.f32 %v1268_v59  ;;  %v3889_v54 = vmul.f32 %v3119_v13, %v1203_v37  ;;  %v1028_v3 = vpop.f32.mrf.mxu0  ;;  %v1206_v44 = vadd.f32 2.0, %v3123_v34  ;;  %v1327_v4 = vmul.f32 %v3121_v35, %v3861_v7 }
 0x1ab   :  { %3130 = vpow2.f32 %v1161_v50  ;;  %v3891_v51 = vadd.f32 %v977_v27, %v929_v40  ;;  %v1029_v1 = vadd.f32 %v1028_v3, %v3788_v49  ;;  %v1077_v58 = vpop.f32.mrf.mxu1  ;;  %v1388_v48 = vpack.c.bf16 %v1362_v41, %v1360_v46 }
 0x1ac   :  { %v3125_v28 = vpop.eup %3124  ;;  %v1238_v10 = vmul.f32 %v3123_v34, %v1206_v44  ;;  %v1267_v33 = vadd.f32 2.0, %v3889_v54  ;;  %v1359_v7 = vmul.f32 %v1327_v4, %v3836_v53 }
 0x1ad   :  { %v1111_v52 = vmin.f32 %v3891_v51, 20.0  ;;  %v3896_v47 = vadd.f32 %v1077_v58, %v1029_v1  ;;  %1664 = vmatmul.bf16.gmra.mxu3 %v1388_v48  ;;  %1762 = vmatmul.bf16.gmra.mxu1 %v1388_v48  ;;  %v1329_v8 = vmul.f32 %v3125_v28, %v1233_v25 }
 0x1ae   :  { %v1270_v19 = vadd.f32 2.0, %v1238_v10 }
 0x1af   :  { %v3127_v0 = vpop.eup %3126  ;;  %v1159_v36 = vmul.f32 1.442695, %v1111_v52  ;;  %v1114_v9 = vmin.f32 %v3896_v47, 20.0  ;;  %v1361_v12 = vmul.f32 %v1329_v8, %v3848_v2 }
 0x1b0   :  { %v3129_v15 = vpop.eup %3128  ;;  %v930_v16 = vpop.f32.mrf.mxu2  ;;  %3132 = vrcp.f32 %v1270_v19  ;;  %v1205_v17 = vadd.f32 2.0, %v3127_v0 }
 0x1b1   :  { %v3131_v45 = vpop.eup %3130  ;;  %3134 = vpow2.f32 %v1159_v36  ;;  %v1165_v20 = vmul.f32 1.442695, %v1114_v9  ;;  %v931_v21 = vadd.f32 %v930_v16, %v3793_v5  ;;  %v979_v61 = vpop.f32.mrf.mxu3  ;;  %v1387_v22 = vpack.c.bf16 %v1361_v12, %v1359_v7  ;;  %v2878_v36 = vld [vmem:[%s4301_s7 + $0x38] sm:$0xff] }
 0x1b2   :  { %3136 = vrcp.f32 %v1267_v33  ;;  %v1208_v38 = vadd.f32 2.0, %v3131_v45  ;;  %v1031_v23 = vpop.f32.mrf.mxu0  ;;  %v1237_v24 = vmul.f32 %v3127_v0, %v1205_v17  ;;  %v1332_v62 = vmul.f32 %v3129_v15, %v3879_v6  ;;  %2229 = vmatpush.bf16.msra.mxu2 %v2878_v36 }
 0x1b3   :  { %3138 = vpow2.f32 %v1165_v20  ;;  %v3903_v14 = vadd.f32 %v979_v61, %v931_v21  ;;  %v1032_v2 = vadd.f32 %v1031_v23, %v3788_v49  ;;  %v1080_v53 = vpop.f32.mrf.mxu1  ;;  %1615 = vmatmul.bf16.gmra.mxu2 %v1387_v22  ;;  %1713 = vmatmul.bf16.gmra.mxu0 %v1387_v22  ;;  %v2886_v21 = vld [vmem:[%s4301_s7 + $0x78] sm:$0xff] }
 0x1b4   :  { %v3907_v25 = vmul.f32 %v3131_v45, %v1208_v38  ;;  %v1269_v55 = vadd.f32 2.0, %v1237_v24  ;;  %v1364_v6 = vmul.f32 %v1332_v62, %v3854_v32  ;;  %2278 = vmatpush.bf16.msra.mxu3 %v2886_v21 }
 0x1b5   :  { %v1113_v11 = vmin.f32 %v3903_v14, 20.0  ;;  %v3910_v60 = vadd.f32 %v1080_v53, %v1032_v2 }
 0x1b6   :  { %v3133_v31 = vpop.eup %3132  ;;  %v1272_v18 = vadd.f32 2.0, %v3907_v25  ;;  %3140 = vrcp.f32 %v1269_v55 }
 0x1b7   :  { %v3135_v56 = vpop.eup %3134  ;;  %v1163_v59 = vmul.f32 1.442695, %v1113_v11  ;;  %v1116_v13 = vmin.f32 %v3910_v60, 20.0  ;;  %v1334_v42 = vmul.f32 %v3133_v31, %v1238_v10 }
 0x1b8   :  { %v3137_v29 = vpop.eup %3136  ;;  %v1207_v43 = vadd.f32 2.0, %v3135_v56  ;;  %v933_v35 = vpop.f32.mrf.mxu2 }
 0x1b9   :  { %v3139_v46 = vpop.eup %3138  ;;  %3142 = vpow2.f32 %v1163_v59  ;;  %v1169_v37 = vmul.f32 1.442695, %v1116_v13  ;;  %v934_v39 = vadd.f32 %v933_v35, %v3793_v5  ;;  %v982_v34 = vpop.f32.mrf.mxu3  ;;  %v1366_v50 = vmul.f32 %v1334_v42, %v3868_v63 }
 0x1ba   :  { %3144 = vrcp.f32 %v1272_v18  ;;  %v3917_v40 = vmul.f32 %v3135_v56, %v1207_v43  ;;  %v1210_v27 = vadd.f32 2.0, %v3139_v46  ;;  %v1033_v41 = vpop.f32.mrf.mxu0  ;;  %v1331_v48 = vmul.f32 %v3137_v29, %v3889_v54 }
 0x1bb   :  { %3146 = vpow2.f32 %v1169_v37  ;;  %v3919_v3 = vadd.f32 %v982_v34, %v934_v39  ;;  %v1034_v32 = vadd.f32 %v1033_v41, %v3788_v49  ;;  %v1082_v44 = vpop.f32.mrf.mxu1  ;;  %v1390_v1 = vpack.c.bf16 %v1366_v50, %v1364_v6 }
 0x1bc   :  { %v3141_v58 = vpop.eup %3140  ;;  %v1242_v28 = vmul.f32 %v3139_v46, %v1210_v27  ;;  %v1271_v52 = vadd.f32 2.0, %v3917_v40  ;;  %v1363_v12 = vmul.f32 %v1331_v48, %v3863_v57 }
 0x1bd   :  { %v1115_v4 = vmin.f32 %v3919_v3, 20.0  ;;  %v3924_v10 = vadd.f32 %v1082_v44, %v1034_v32  ;;  %1669 = vmatmul.bf16.gmra.mxu3 %v1390_v1  ;;  %1767 = vmatmul.bf16.gmra.mxu1 %v1390_v1  ;;  %v1333_v63 = vmul.f32 %v3141_v58, %v1237_v24 }
 0x1be   :  { %v1274_v8 = vadd.f32 2.0, %v1242_v28 }
 0x1bf   :  { %v3143_v33 = vpop.eup %3142  ;;  %v1167_v19 = vmul.f32 1.442695, %v1115_v4  ;;  %v1118_v0 = vmin.f32 %v3924_v10, 20.0  ;;  %v1365_v54 = vmul.f32 %v1333_v63, %v3875_v26 }
 0x1c0   :  { %v3145_v9 = vpop.eup %3144  ;;  %3148 = vrcp.f32 %v1274_v8  ;;  %v1209_v15 = vadd.f32 2.0, %v3143_v33  ;;  %v935_v7 = vpop.f32.mrf.mxu2 }
 0x1c1   :  { %v3147_v16 = vpop.eup %3146  ;;  %3150 = vpow2.f32 %v1167_v19  ;;  %v1173_v17 = vmul.f32 1.442695, %v1118_v0  ;;  %v936_v45 = vadd.f32 %v935_v7, %v3793_v5  ;;  %v984_v20 = vpop.f32.mrf.mxu3  ;;  %v1389_v23 = vpack.c.bf16 %v1365_v54, %v1363_v12 }
 0x1c2   :  { %3152 = vrcp.f32 %v1271_v52  ;;  %v1241_v61 = vmul.f32 %v3143_v33, %v1209_v15  ;;  %v1212_v26 = vadd.f32 2.0, %v3147_v16  ;;  %v1036_v38 = vpop.f32.mrf.mxu0  ;;  %v1336_v2 = vmul.f32 %v3145_v9, %v3907_v25 }
 0x1c3   :  { %3154 = vpow2.f32 %v1173_v17  ;;  %v3937_v57 = vadd.f32 %v984_v20, %v936_v45  ;;  %v1037_v22 = vadd.f32 %v1036_v38, %v3788_v49  ;;  %v1085_v24 = vpop.f32.mrf.mxu1  ;;  %1620 = vmatmul.bf16.gmra.mxu2 %v1389_v23  ;;  %1718 = vmatmul.bf16.gmra.mxu0 %v1389_v23 }
 0x1c4   :  { %v1273_v53 = vadd.f32 2.0, %v1241_v61  ;;  %v3941_v62 = vmul.f32 %v3147_v16, %v1212_v26  ;;  %v1368_v25 = vmul.f32 %v1336_v2, %v3882_v30 }
 0x1c5   :  { %v1117_v55 = vmin.f32 %v3937_v57, 20.0  ;;  %v3944_v11 = vadd.f32 %v1085_v24, %v1037_v22 }
 0x1c6   :  { %v3149_v31 = vpop.eup %3148  ;;  %3156 = vrcp.f32 %v1273_v53  ;;  %v1276_v18 = vadd.f32 2.0, %v3941_v62 }
 0x1c7   :  { %v3151_v56 = vpop.eup %3150  ;;  %v1338_v59 = vmul.f32 %v3149_v31, %v1242_v28  ;;  %v1171_v13 = vmul.f32 1.442695, %v1117_v55  ;;  %v1120_v42 = vmin.f32 %v3944_v11, 20.0 }
 0x1c8   :  { %v3153_v29 = vpop.eup %3152  ;;  %v1211_v6 = vadd.f32 2.0, %v3151_v56  ;;  %v938_v43 = vpop.f32.mrf.mxu2 }
 0x1c9   :  { %v3155_v35 = vpop.eup %3154  ;;  %v1370_v46 = vmul.f32 %v1338_v59, %v3896_v47  ;;  %3158 = vpow2.f32 %v1171_v13  ;;  %v1177_v37 = vmul.f32 1.442695, %v1120_v42  ;;  %v939_v39 = vadd.f32 %v938_v43, %v3793_v5  ;;  %v987_v34 = vpop.f32.mrf.mxu3 }
 0x1ca   :  { %3160 = vrcp.f32 %v1276_v18  ;;  %v3951_v50 = vmul.f32 %v3151_v56, %v1211_v6  ;;  %v1214_v27 = vadd.f32 2.0, %v3155_v35  ;;  %v1038_v41 = vpop.f32.mrf.mxu0  ;;  %v1335_v47 = vmul.f32 %v3153_v29, %v3917_v40  ;;  %v2877_v40 = vld [vmem:[%s4301_s7 + $0x30] sm:$0xff] }
 0x1cb   :  { %3162 = vpow2.f32 %v1177_v37  ;;  %v3953_v32 = vadd.f32 %v987_v34, %v939_v39  ;;  %v1039_v30 = vadd.f32 %v1038_v41, %v3788_v49  ;;  %v1087_v44 = vpop.f32.mrf.mxu1  ;;  %v1392_v1 = vpack.c.bf16 %v1370_v46, %v1368_v25  ;;  %2230 = vmatpush.bf16.msra.mxu2 %v2877_v40 }
 0x1cc   :  { %v3157_v58 = vpop.eup %3156  ;;  %v1246_v48 = vmul.f32 %v3155_v35, %v1214_v27  ;;  %v1275_v52 = vadd.f32 2.0, %v3951_v50  ;;  %v1367_v9 = vmul.f32 %v1335_v47, %v3891_v51 }
 0x1cd   :  { %v1337_v28 = vmul.f32 %v3157_v58, %v1241_v61  ;;  %v1119_v4 = vmin.f32 %v3953_v32, 20.0  ;;  %v3958_v63 = vadd.f32 %v1087_v44, %v1039_v30  ;;  %1674 = vmatmul.bf16.gmra.mxu3 %v1392_v1  ;;  %1772 = vmatmul.bf16.gmra.mxu1 %v1392_v1 }
 0x1ce   :  { %v1278_v8 = vadd.f32 2.0, %v1246_v48 }
 0x1cf   :  { %v3159_v33 = vpop.eup %3158  ;;  %v1369_v19 = vmul.f32 %v1337_v28, %v3903_v14  ;;  %v1175_v0 = vmul.f32 1.442695, %v1119_v4  ;;  %v1122_v36 = vmin.f32 %v3958_v63, 20.0  ;;  %v2885_v14 = vld [vmem:[%s4301_s7 + $0x70] sm:$0xff] }
 0x1d0   :  { %v3161_v54 = vpop.eup %3160  ;;  %3164 = vrcp.f32 %v1278_v8  ;;  %v1213_v12 = vadd.f32 2.0, %v3159_v33  ;;  %v940_v15 = vpop.f32.mrf.mxu2  ;;  %2279 = vmatpush.bf16.msra.mxu3 %v2885_v14 }
 0x1d1   :  { %v3163_v7 = vpop.eup %3162  ;;  %3166 = vpow2.f32 %v1175_v0  ;;  %v1181_v16 = vmul.f32 1.442695, %v1122_v36  ;;  %v941_v17 = vadd.f32 %v940_v15, %v3793_v5  ;;  %v989_v45 = vpop.f32.mrf.mxu3  ;;  %v1391_v26 = vpack.c.bf16 %v1369_v19, %v1367_v9  ;;  %v2884_v36 = vld [vmem:[%s4301_s7 + $0x68] sm:$0xff] }
 0x1d2   :  { %3168 = vrcp.f32 %v1275_v52  ;;  %v1245_v20 = vmul.f32 %v3159_v33, %v1213_v12  ;;  %v1216_v21 = vadd.f32 2.0, %v3163_v7  ;;  %v1041_v61 = vpop.f32.mrf.mxu0  ;;  %v1340_v22 = vmul.f32 %v3161_v54, %v3941_v62 }
 0x1d3   :  { %3170 = vpow2.f32 %v1181_v16  ;;  %v3971_v51 = vadd.f32 %v989_v45, %v941_v17  ;;  %v1042_v38 = vadd.f32 %v1041_v61, %v3788_v49  ;;  %v1090_v23 = vpop.f32.mrf.mxu1  ;;  %1625 = vmatmul.bf16.gmra.mxu2 %v1391_v26  ;;  %1723 = vmatmul.bf16.gmra.mxu0 %v1391_v26  ;;  %v2883_v16 = vld [vmem:[%s4301_s7 + $0x60] sm:$0xff] }
 0x1d4   :  { %v1277_v24 = vadd.f32 2.0, %v1245_v20  ;;  %v3975_v2 = vmul.f32 %v3163_v7, %v1216_v21  ;;  %v1372_v29 = vmul.f32 %v1340_v22, %v3910_v60  ;;  %2280 = vmatpush.bf16.msra.mxu3 %v2884_v36  ;;  %v2875_v7 = vld [vmem:[%s4301_s7 + $0x20] sm:$0xff]  ;;  %v2882_v22 = vld [vmem:[%s4301_s7 + $0x58] sm:$0xff] }
 0x1d5   :  { %v1121_v53 = vmin.f32 %v3971_v51, 20.0  ;;  %v3978_v55 = vadd.f32 %v1090_v23, %v1042_v38  ;;  %v2874_v23 = vld [vmem:[%s4301_s7 + $0x18] sm:$0xff] }
 0x1d6   :  { %v3165_v31 = vpop.eup %3164  ;;  %3172 = vrcp.f32 %v1277_v24  ;;  %v1280_v62 = vadd.f32 2.0, %v3975_v2 }
 0x1d7   :  { %v3167_v18 = vpop.eup %3166  ;;  %v1342_v56 = vmul.f32 %v3165_v31, %v1246_v48  ;;  %v1179_v59 = vmul.f32 1.442695, %v1121_v53  ;;  %v1124_v13 = vmin.f32 %v3978_v55, 20.0 }
 0x1d8   :  { %v3169_v42 = vpop.eup %3168  ;;  %v1215_v25 = vadd.f32 2.0, %v3167_v18  ;;  %v943_v6 = vpop.f32.mrf.mxu2  ;;  %2281 = vmatpush.bf16.msra.mxu3 %v2883_v16 }
 0x1d9   :  { %v3171_v43 = vpop.eup %3170  ;;  %v1374_v35 = vmul.f32 %v1342_v56, %v3924_v10  ;;  %3174 = vpow2.f32 %v1179_v59  ;;  %v1185_v46 = vmul.f32 1.442695, %v1124_v13  ;;  %v944_v37 = vadd.f32 %v943_v6, %v3793_v5  ;;  %v992_v39 = vpop.f32.mrf.mxu3 }
 0x1da   :  { %v3985_v34 = vmul.f32 %v3167_v18, %v1215_v25  ;;  %v1218_v27 = vadd.f32 2.0, %v3171_v43  ;;  %v1043_v41 = vpop.f32.mrf.mxu0  ;;  %v1339_v58 = vmul.f32 %v3169_v42, %v3951_v50  ;;  %v2876_v50 = vld [vmem:[%s4301_s7 + $0x28] sm:$0xff] }
 0x1db   :  { %3176 = vpow2.f32 %v1185_v46  ;;  %v3987_v30 = vadd.f32 %v992_v39, %v944_v37  ;;  %v1044_v60 = vadd.f32 %v1043_v41, %v3788_v49  ;;  %v1394_v44 = vpack.c.bf16 %v1374_v35, %v1372_v29  ;;  %v1092_v47 = vpop.f32.mrf.mxu1  ;;  %2231 = vmatpush.bf16.msra.mxu2 %v2876_v50 }
 0x1dc   :  { %v3173_v1 = vpop.eup %3172  ;;  %3178 = vrcp.f32 %v1280_v62  ;;  %v1250_v10 = vmul.f32 %v3171_v43, %v1218_v27  ;;  %v1279_v52 = vadd.f32 2.0, %v3985_v34  ;;  %v1371_v40 = vmul.f32 %v1339_v58, %v3919_v3  ;;  %2282 = vmatpush.bf16.msra.mxu3 %v2882_v22 }
 0x1dd   :  { %v1341_v48 = vmul.f32 %v3173_v1, %v1245_v20  ;;  %v1123_v28 = vmin.f32 %v3987_v30, 20.0  ;;  %v3992_v4 = vadd.f32 %v1092_v47, %v1044_v60  ;;  %1679 = vmatmul.bf16.gmra.mxu3 %v1394_v44  ;;  %1777 = vmatmul.bf16.gmra.mxu1 %v1394_v44 }
 0x1de   :  { %v1282_v8 = vadd.f32 2.0, %v1250_v10 }
 0x1df   :  { %v3175_v33 = vpop.eup %3174  ;;  %v1373_v49 = vmul.f32 %v1341_v48, %v3937_v57  ;;  %v1183_v19 = vmul.f32 1.442695, %v1123_v28  ;;  %v1126_v0 = vmin.f32 %v3992_v4, 20.0  ;;  %2232 = vmatpush.bf16.msra.mxu2 %v2875_v7 }
 0x1e0   :  { %3180 = vrcp.f32 %v1282_v8  ;;  %v1217_v54 = vadd.f32 2.0, %v3175_v33  ;;  %v945_v9 = vpop.f32.mrf.mxu2 }
 0x1e1   :  { %v3177_v12 = vpop.eup %3176  ;;  %3182 = vpow2.f32 %v1183_v19  ;;  %v1189_v15 = vmul.f32 1.442695, %v1126_v0  ;;  %v946_v57 = vadd.f32 %v945_v9, %v3793_v5  ;;  %v994_v14 = vpop.f32.mrf.mxu3  ;;  %v1393_v20 = vpack.c.bf16 %v1373_v49, %v1371_v40  ;;  %v1431_v40 = vld [vmem:[#allocation10] sm:$0x3]  ;;  %v2873_v9 = vld [vmem:[%s4301_s7 + $0x10] sm:$0xff] }
 0x1e2   :  { %v3179_v17 = vpop.eup %3178  ;;  %3184 = vrcp.f32 %v1279_v52  ;;  %v1249_v3 = vmul.f32 %v3175_v33, %v1217_v54  ;;  %v1220_v45 = vadd.f32 2.0, %v3177_v12  ;;  %v4030_v54 = vperm.slane %v1431_v40, 1 }
 0x1e3   :  { %3186 = vpow2.f32 %v1189_v15  ;;  %v4011_v21 = vadd.f32 %v994_v14, %v946_v57  ;;  %1630 = vmatmul.bf16.gmra.mxu2 %v1393_v20  ;;  %1728 = vmatmul.bf16.gmra.mxu0 %v1393_v20  ;;  %v1344_v26 = vmul.f32 %v3179_v17, %v3975_v2  ;;  %v2880_v57 = vld [vmem:[%s4301_s7 + $0x48] sm:$0xff]  ;;  %v4044_v16 = vperm.slane %v1431_v40, 0 }
 0x1e4   :  { %v1281_v5 = vadd.f32 2.0, %v1249_v3  ;;  %v1252_v61 = vmul.f32 %v3177_v12, %v1220_v45  ;;  %2233 = vmatpush.bf16.msra.mxu2 %v2874_v23  ;;  %v2879_v45 = vld [vmem:[%s4301_s7 + $0x40] sm:$0xff] }
 0x1e5   :  { %v1125_v38 = vmin.f32 %v4011_v21, 20.0  ;;  %v1376_v42 = vmul.f32 %v1344_v26, %v3944_v11 }
 0x1e6   :  { %v3181_v24 = vpop.eup %3180  ;;  %3188 = vrcp.f32 %v1281_v5  ;;  %v1284_v59 = vadd.f32 2.0, %v1252_v61 }
 0x1e7   :  { %v3183_v53 = vpop.eup %3182  ;;  %v1346_v31 = vmul.f32 %v3181_v24, %v1250_v10  ;;  %v1187_v18 = vmul.f32 1.442695, %v1125_v38 }
 0x1e8   :  { %v3185_v56 = vpop.eup %3184  ;;  %v1219_v2 = vadd.f32 2.0, %v3183_v53  ;;  %2234 = vmatpush.bf16.msra.mxu2 %v2873_v9 }
 0x1e9   :  { %v3187_v13 = vpop.eup %3186  ;;  %v1378_v29 = vmul.f32 %v1346_v31, %v3958_v63  ;;  %3190 = vpow2.f32 %v1187_v18  ;;  %v1343_v6 = vmul.f32 %v3185_v56, %v3985_v34 }
 0x1ea   :  { %v1251_v62 = vmul.f32 %v3183_v53, %v1219_v2  ;;  %v1222_v25 = vadd.f32 2.0, %v3187_v13  ;;  %3192 = vrcp.f32 %v1284_v59  ;;  %v2871_v53 = vld [vmem:[%s4301_s7] sm:$0xff] }
 0x1eb   :  { %v1396_v43 = vpack.c.bf16 %v1378_v29, %v1376_v42  ;;  %v1375_v11 = vmul.f32 %v1343_v6, %v3953_v32 }
 0x1ec   :  { %v3189_v35 = vpop.eup %3188  ;;  %v1254_v46 = vmul.f32 %v3187_v13, %v1222_v25  ;;  %v1283_v39 = vadd.f32 2.0, %v1251_v62 }
 0x1ed   :  { %v1345_v37 = vmul.f32 %v3189_v35, %v1249_v3  ;;  %1684 = vmatmul.bf16.gmra.mxu3 %v1396_v43  ;;  %1782 = vmatmul.bf16.gmra.mxu1 %v1396_v43 }
 0x1ee   :  { %v1286_v27 = vadd.f32 2.0, %v1254_v46 }
 0x1ef   :  { %v3191_v41 = vpop.eup %3190  ;;  %v1377_v63 = vmul.f32 %v1345_v37, %v3971_v51 }
 0x1f0   :  { %3194 = vrcp.f32 %v1286_v27  ;;  %v1221_v60 = vadd.f32 2.0, %v3191_v41  ;;  %v3193_v1 = vpop.eup %3192 }
 0x1f1   :  { %v1395_v44 = vpack.c.bf16 %v1377_v63, %v1375_v11  ;;  %3196 = vrcp.f32 %v1283_v39  ;;  %v1348_v10 = vmul.f32 %v3193_v1, %v1252_v61  ;;  %v2872_v61 = vld [vmem:[%s4301_s7 + $0x8] sm:$0xff] }
 0x1f2   :  { %v1253_v34 = vmul.f32 %v3191_v41, %v1221_v60  ;;  %2235 = vmatpush.bf16.msra.mxu2 %v2872_v61 }
 0x1f3   :  { %1635 = vmatmul.bf16.gmra.mxu2 %v1395_v44  ;;  %1733 = vmatmul.bf16.gmra.mxu0 %v1395_v44  ;;  %v1380_v52 = vmul.f32 %v1348_v10, %v3978_v55  ;;  %v2881_v55 = vld [vmem:[%s4301_s7 + $0x50] sm:$0xff] }
 0x1f4   :  { %v1285_v58 = vadd.f32 2.0, %v1253_v34  ;;  %2283 = vmatpush.bf16.msra.mxu3 %v2881_v55 }
 0x1f6   :  { %v3195_v47 = vpop.eup %3194  ;;  %3198 = vrcp.f32 %v1285_v58  ;;  %2236 = vmatpush.bf16.msra.mxu2 %v2871_v53 }
 0x1f7   :  { %v1350_v48 = vmul.f32 %v3195_v47, %v1254_v46  ;;  %v3197_v28 = vpop.eup %3196 }
 0x1f8   :  { %v1347_v8 = vmul.f32 %v3197_v28, %v1251_v62  ;;  %2284 = vmatpush.bf16.msra.mxu3 %v2880_v57 }
 0x1f9   :  { %v1382_v32 = vmul.f32 %v1350_v48, %v3992_v4 }
 0x1fa   :  { %v1379_v19 = vmul.f32 %v1347_v8, %v3987_v30 }
 0x1fb   :  { %v1398_v51 = vpack.c.bf16 %v1382_v32, %v1380_v52 }
 0x1fc   :  { %v3199_v33 = vpop.eup %3198  ;;  %2285 = vmatpush.bf16.msra.mxu3 %v2879_v45 }
 0x1fd   :  { %v1349_v49 = vmul.f32 %v3199_v33, %v1253_v34  ;;  %1689 = vmatmul.bf16.gmra.mxu3 %v1398_v51  ;;  %1787 = vmatmul.bf16.gmra.mxu1 %v1398_v51 }
 0x1ff   :  { %v1381_v0 = vmul.f32 %v1349_v49, %v4011_v21 }
 0x201   :  { %v1397_v50 = vpack.c.bf16 %v1381_v0, %v1379_v19 }
 0x203   :  { %1640 = vmatmul.bf16.gmra.mxu2 %v1397_v50  ;;  %1738 = vmatmul.bf16.gmra.mxu0 %v1397_v50 }
 0x20a   :  { %v1753_v36 = vpop.f32.mrf.mxu1 }
 0x210   :  { %v1655_v4 = vpop.f32.mrf.mxu3  ;;  %v1704_v12 = vpop.f32.mrf.mxu0 }
 0x211   :  { %v1705_v30 = vadd.f32 %v1704_v12, %v4030_v54 }
 0x212   :  { %v1755_v15 = vpop.f32.mrf.mxu1 }
 0x213   :  { %v4042_v7 = vadd.f32 %v1753_v36, %v1705_v30 }
 0x215   :  { %v1794_v17 = vmin.f32 %v4042_v7, 20.0 }
 0x216   :  { %v1606_v3 = vpop.f32.mrf.mxu2 }
 0x217   :  { %v1827_v14 = vmul.f32 1.442695, %v1794_v17  ;;  %v1607_v20 = vadd.f32 %v1606_v3, %v4044_v16 }
 0x218   :  { %v1657_v21 = vpop.f32.mrf.mxu3  ;;  %v1706_v5 = vpop.f32.mrf.mxu0 }
 0x219   :  { %3200 = vpow2.f32 %v1827_v14  ;;  %v4054_v26 = vadd.f32 %v1655_v4, %v1607_v20  ;;  %v1707_v38 = vadd.f32 %v1706_v5, %v4030_v54 }
 0x21a   :  { %v1758_v23 = vpop.f32.mrf.mxu1 }
 0x21b   :  { %v1793_v22 = vmin.f32 %v4054_v26, 20.0  ;;  %v4058_v24 = vadd.f32 %v1755_v15, %v1707_v38 }
 0x21d   :  { %v1825_v31 = vmul.f32 1.442695, %v1793_v22  ;;  %v1796_v18 = vmin.f32 %v4058_v24, 20.0 }
 0x21e   :  { %v1608_v56 = vpop.f32.mrf.mxu2 }
 0x21f   :  { %v3201_v59 = vpop.eup %3200  ;;  %3202 = vpow2.f32 %v1825_v31  ;;  %v1831_v2 = vmul.f32 1.442695, %v1796_v18  ;;  %v1609_v13 = vadd.f32 %v1608_v56, %v4044_v16 }
 0x220   :  { %v1660_v42 = vpop.f32.mrf.mxu3  ;;  %v1890_v29 = vadd.f32 2.0, %v3201_v59  ;;  %v1709_v62 = vpop.f32.mrf.mxu0 }
 0x221   :  { %3204 = vpow2.f32 %v1831_v2  ;;  %v4065_v25 = vadd.f32 %v1657_v21, %v1609_v13  ;;  %v1710_v6 = vadd.f32 %v1709_v62, %v4030_v54 }
 0x222   :  { %v1760_v43 = vpop.f32.mrf.mxu1  ;;  %v1922_v35 = vmul.f32 %v3201_v59, %v1890_v29 }
 0x223   :  { %v1795_v46 = vmin.f32 %v4065_v25, 20.0  ;;  %v4069_v37 = vadd.f32 %v1758_v23, %v1710_v6 }
 0x224   :  { %v1954_v39 = vadd.f32 2.0, %v1922_v35 }
 0x225   :  { %v3203_v27 = vpop.eup %3202  ;;  %v1829_v41 = vmul.f32 1.442695, %v1795_v46  ;;  %v1798_v11 = vmin.f32 %v4069_v37, 20.0 }
 0x226   :  { %v1889_v63 = vadd.f32 2.0, %v3203_v27  ;;  %v1611_v60 = vpop.f32.mrf.mxu2 }
 0x227   :  { %v3205_v44 = vpop.eup %3204  ;;  %3206 = vpow2.f32 %v1829_v41  ;;  %v1835_v1 = vmul.f32 1.442695, %v1798_v11  ;;  %v1612_v34 = vadd.f32 %v1611_v60, %v4044_v16 }
 0x228   :  { %v1662_v58 = vpop.f32.mrf.mxu3  ;;  %3208 = vrcp.f32 %v1954_v39  ;;  %v1921_v10 = vmul.f32 %v3203_v27, %v1889_v63  ;;  %v1892_v47 = vadd.f32 2.0, %v3205_v44  ;;  %v1711_v48 = vpop.f32.mrf.mxu0 }
 0x229   :  { %3210 = vpow2.f32 %v1835_v1  ;;  %v4073_v28 = vadd.f32 %v1660_v42, %v1612_v34  ;;  %v1712_v52 = vadd.f32 %v1711_v48, %v4030_v54 }
 0x22a   :  { %v1763_v32 = vpop.f32.mrf.mxu1  ;;  %v1953_v8 = vadd.f32 2.0, %v1921_v10  ;;  %v1924_v51 = vmul.f32 %v3205_v44, %v1892_v47 }
 0x22b   :  { %v1797_v33 = vmin.f32 %v4073_v28, 20.0  ;;  %v4077_v49 = vadd.f32 %v1760_v43, %v1712_v52 }
 0x22c   :  { %v1956_v19 = vadd.f32 2.0, %v1924_v51  ;;  %3212 = vrcp.f32 %v1953_v8 }
 0x22d   :  { %v3207_v0 = vpop.eup %3206  ;;  %v1833_v50 = vmul.f32 1.442695, %v1797_v33  ;;  %v1800_v36 = vmin.f32 %v4077_v49, 20.0 }
 0x22e   :  { %v3209_v40 = vpop.eup %3208  ;;  %3214 = vrcp.f32 %v1956_v19  ;;  %v1891_v55 = vadd.f32 2.0, %v3207_v0  ;;  %v1613_v4 = vpop.f32.mrf.mxu2 }
 0x22f   :  { %v3211_v9 = vpop.eup %3210  ;;  %3216 = vpow2.f32 %v1833_v50  ;;  %v1839_v12 = vmul.f32 1.442695, %v1800_v36  ;;  %v1614_v30 = vadd.f32 %v1613_v4, %v4044_v16  ;;  %v2018_v21 = vmul.f32 %v3209_v40, %v1922_v35 }
 0x230   :  { %v1665_v15 = vpop.f32.mrf.mxu3  ;;  %v1923_v57 = vmul.f32 %v3207_v0, %v1891_v55  ;;  %v1894_v17 = vadd.f32 2.0, %v3211_v9  ;;  %v1714_v3 = vpop.f32.mrf.mxu0 }
 0x231   :  { %3218 = vpow2.f32 %v1839_v12  ;;  %v4081_v45 = vadd.f32 %v1662_v58, %v1614_v30  ;;  %v1715_v14 = vadd.f32 %v1714_v3, %v4030_v54  ;;  %v2050_v2 = vmul.f32 %v2018_v21, %v4042_v7 }
 0x232   :  { %v1765_v20 = vpop.f32.mrf.mxu1  ;;  %v1955_v5 = vadd.f32 2.0, %v1923_v57  ;;  %v4084_v61 = vmul.f32 %v3211_v9, %v1894_v17  ;;  %v3213_v38 = vpop.eup %3212 }
 0x233   :  { %v1799_v23 = vmin.f32 %v4081_v45, 20.0  ;;  %v4087_v22 = vadd.f32 %v1763_v32, %v1715_v14  ;;  %v2017_v39 = vmul.f32 %v3213_v38, %v1921_v10 }
 0x234   :  { %v3215_v53 = vpop.eup %3214  ;;  %3220 = vrcp.f32 %v1955_v5  ;;  %v1958_v13 = vadd.f32 2.0, %v4084_v61 }
 0x235   :  { %v3217_v31 = vpop.eup %3216  ;;  %v2020_v18 = vmul.f32 %v3215_v53, %v1924_v51  ;;  %v1837_v56 = vmul.f32 1.442695, %v1799_v23  ;;  %v1802_v59 = vmin.f32 %v4087_v22, 20.0  ;;  %v2049_v32 = vmul.f32 %v2017_v39, %v4054_v26 }
 0x236   :  { %v1893_v42 = vadd.f32 2.0, %v3217_v31  ;;  %v1616_v29 = vpop.f32.mrf.mxu2 }
 0x237   :  { %v3219_v62 = vpop.eup %3218  ;;  %v2052_v6 = vmul.f32 %v2020_v18, %v4058_v24  ;;  %3222 = vpow2.f32 %v1837_v56  ;;  %v1843_v43 = vmul.f32 1.442695, %v1802_v59  ;;  %v1617_v35 = vadd.f32 %v1616_v29, %v4044_v16 }
 0x238   :  { %v1667_v46 = vpop.f32.mrf.mxu3  ;;  %v4094_v27 = vmul.f32 %v3217_v31, %v1893_v42  ;;  %v1896_v41 = vadd.f32 2.0, %v3219_v62  ;;  %v1716_v11 = vpop.f32.mrf.mxu0 }
 0x239   :  { %v2082_v63 = vpack.c.bf16 %v2052_v6, %v2050_v2  ;;  %3224 = vpow2.f32 %v1843_v43  ;;  %v4096_v7 = vadd.f32 %v1665_v15, %v1617_v35  ;;  %v1717_v60 = vadd.f32 %v1716_v11, %v4030_v54 }
 0x23a   :  { %v1768_v44 = vpop.f32.mrf.mxu1  ;;  %v3221_v1 = vpop.eup %3220  ;;  %3226 = vrcp.f32 %v1958_v13  ;;  %v1928_v24 = vmul.f32 %v3219_v62, %v1896_v41  ;;  %v1957_v10 = vadd.f32 2.0, %v4094_v27 }
 0x23b   :  { %v2019_v34 = vmul.f32 %v3221_v1, %v1923_v57  ;;  %v1801_v58 = vmin.f32 %v4096_v7, 20.0  ;;  %v4100_v47 = vadd.f32 %v1765_v20, %v1717_v60  ;;  %2286 = vmatmul.bf16.vlgmr.msra.gmra.mxu3 %v2082_v63 }
 0x23c   :  { %v1960_v48 = vadd.f32 2.0, %v1928_v24 }
 0x23d   :  { %v3223_v52 = vpop.eup %3222  ;;  %v2051_v8 = vmul.f32 %v2019_v34, %v4065_v25  ;;  %v1841_v51 = vmul.f32 1.442695, %v1801_v58  ;;  %v1804_v33 = vmin.f32 %v4100_v47, 20.0 }
 0x23e   :  { %3228 = vrcp.f32 %v1960_v48  ;;  %v1895_v19 = vadd.f32 2.0, %v3223_v52  ;;  %v1618_v0 = vpop.f32.mrf.mxu2 }
 0x23f   :  { %v3225_v50 = vpop.eup %3224  ;;  %v2081_v36 = vpack.c.bf16 %v2051_v8, %v2049_v32  ;;  %3230 = vpow2.f32 %v1841_v51  ;;  %v1847_v40 = vmul.f32 1.442695, %v1804_v33  ;;  %v1619_v30 = vadd.f32 %v1618_v0, %v4044_v16 }
 0x240   :  { %v1670_v55 = vpop.f32.mrf.mxu3  ;;  %v3227_v4 = vpop.eup %3226  ;;  %3232 = vrcp.f32 %v1957_v10  ;;  %v1927_v9 = vmul.f32 %v3223_v52, %v1895_v19  ;;  %v1898_v12 = vadd.f32 2.0, %v3225_v50 }
 0x241   :  { %v1719_v26 = vpop.f32.mrf.mxu0  ;;  %3234 = vpow2.f32 %v1847_v40  ;;  %2237 = vmatmul.bf16.vlgmr.msra.gmra.mxu2 %v2081_v36  ;;  %v4110_v3 = vadd.f32 %v1667_v46, %v1619_v30  ;;  %v2022_v14 = vmul.f32 %v3227_v4, %v4084_v61 }
 0x242   :  { %v1720_v25 = vadd.f32 %v1719_v26, %v4030_v54  ;;  %v1770_v15 = vpop.f32.mrf.mxu1  ;;  %v1959_v57 = vadd.f32 2.0, %v1927_v9  ;;  %v4108_v17 = vmul.f32 %v3225_v50, %v1898_v12 }
 0x243   :  { %v1803_v5 = vmin.f32 %v4110_v3, 20.0  ;;  %v2054_v42 = vmul.f32 %v2022_v14, %v4069_v37 }
 0x244   :  { %v4113_v20 = vadd.f32 %v1768_v44, %v1720_v25  ;;  %v3229_v21 = vpop.eup %3228  ;;  %3236 = vrcp.f32 %v1959_v57  ;;  %v1962_v18 = vadd.f32 2.0, %v4108_v17 }
 0x245   :  { %v3231_v38 = vpop.eup %3230  ;;  %v2024_v23 = vmul.f32 %v3229_v21, %v1928_v24  ;;  %v1845_v59 = vmul.f32 1.442695, %v1803_v5 }
 0x246   :  { %v1806_v53 = vmin.f32 %v4113_v20, 20.0  ;;  %v3233_v31 = vpop.eup %3232  ;;  %v1897_v56 = vadd.f32 2.0, %v3231_v38  ;;  %v1621_v2 = vpop.f32.mrf.mxu2 }
 0x247   :  { %v3235_v13 = vpop.eup %3234  ;;  %v2056_v61 = vmul.f32 %v2024_v23, %v4077_v49  ;;  %v1622_v62 = vadd.f32 %v1621_v2, %v4044_v16  ;;  %3238 = vpow2.f32 %v1845_v59  ;;  %v2021_v37 = vmul.f32 %v3233_v31, %v4094_v27 }
 0x248   :  { %v1851_v29 = vmul.f32 1.442695, %v1806_v53  ;;  %v1672_v6 = vpop.f32.mrf.mxu3  ;;  %v4121_v43 = vmul.f32 %v3231_v38, %v1897_v56  ;;  %v1900_v35 = vadd.f32 2.0, %v3235_v13 }
 0x249   :  { %v1721_v46 = vpop.f32.mrf.mxu0  ;;  %v4123_v39 = vadd.f32 %v1670_v55, %v1622_v62  ;;  %v2084_v63 = vpack.c.bf16 %v2056_v61, %v2054_v42  ;;  %v2053_v8 = vmul.f32 %v2021_v37, %v4073_v28 }
 0x24a   :  { %3240 = vpow2.f32 %v1851_v29  ;;  %v1722_v41 = vadd.f32 %v1721_v46, %v4030_v54  ;;  %v1773_v11 = vpop.f32.mrf.mxu1  ;;  %v3237_v60 = vpop.eup %3236  ;;  %v1932_v49 = vmul.f32 %v3235_v13, %v1900_v35  ;;  %v1961_v34 = vadd.f32 2.0, %v4121_v43 }
 0x24b   :  { %3242 = vrcp.f32 %v1962_v18  ;;  %v2023_v44 = vmul.f32 %v3237_v60, %v1927_v9  ;;  %v1805_v1 = vmin.f32 %v4123_v39, 20.0  ;;  %2291 = vmatmul.bf16.gmra.mxu3 %v2084_v63 }
 0x24c   :  { %v4128_v24 = vadd.f32 %v1770_v15, %v1722_v41  ;;  %v1964_v58 = vadd.f32 2.0, %v1932_v49 }
 0x24d   :  { %v2055_v10 = vmul.f32 %v2023_v44, %v4081_v45  ;;  %v1849_v48 = vmul.f32 1.442695, %v1805_v1  ;;  %v3239_v32 = vpop.eup %3238 }
 0x24e   :  { %v1808_v52 = vmin.f32 %v4128_v24, 20.0  ;;  %3244 = vrcp.f32 %v1964_v58  ;;  %v1623_v27 = vpop.f32.mrf.mxu2  ;;  %v1899_v33 = vadd.f32 2.0, %v3239_v32 }
 0x24f   :  { %3246 = vpow2.f32 %v1849_v48  ;;  %v1624_v40 = vadd.f32 %v1623_v27, %v4044_v16  ;;  %v2083_v45 = vpack.c.bf16 %v2055_v10, %v2053_v8 }
 0x250   :  { %v3241_v51 = vpop.eup %3240  ;;  %v1855_v19 = vmul.f32 1.442695, %v1808_v52  ;;  %v1675_v0 = vpop.f32.mrf.mxu3  ;;  %3248 = vrcp.f32 %v1961_v34  ;;  %v1931_v4 = vmul.f32 %v3239_v32, %v1899_v33 }
 0x251   :  { %v3243_v50 = vpop.eup %3242  ;;  %v1902_v36 = vadd.f32 2.0, %v3241_v51  ;;  %v1724_v55 = vpop.f32.mrf.mxu0  ;;  %v4138_v30 = vadd.f32 %v1672_v6, %v1624_v40  ;;  %2242 = vmatmul.bf16.gmra.mxu2 %v2083_v45 }
 0x252   :  { %3250 = vpow2.f32 %v1855_v19  ;;  %v1725_v9 = vadd.f32 %v1724_v55, %v4030_v54  ;;  %v1775_v12 = vpop.f32.mrf.mxu1  ;;  %v2026_v26 = vmul.f32 %v3243_v50, %v4108_v17  ;;  %v1963_v25 = vadd.f32 2.0, %v1931_v4 }
 0x253   :  { %v4136_v28 = vmul.f32 %v3241_v51, %v1902_v36  ;;  %v1807_v14 = vmin.f32 %v4138_v30, 20.0 }
 0x254   :  { %v4141_v15 = vadd.f32 %v1773_v11, %v1725_v9  ;;  %v3245_v57 = vpop.eup %3244  ;;  %3252 = vrcp.f32 %v1963_v25  ;;  %v2058_v17 = vmul.f32 %v2026_v26, %v4087_v22 }
 0x255   :  { %v3247_v21 = vpop.eup %3246  ;;  %v2028_v5 = vmul.f32 %v3245_v57, %v1932_v49  ;;  %v1966_v53 = vadd.f32 2.0, %v4136_v28  ;;  %v1853_v18 = vmul.f32 1.442695, %v1807_v14 }
 0x256   :  { %v1810_v38 = vmin.f32 %v4141_v15, 20.0  ;;  %v3249_v23 = vpop.eup %3248  ;;  %v1901_v31 = vadd.f32 2.0, %v3247_v21  ;;  %v1626_v56 = vpop.f32.mrf.mxu2 }
 0x257   :  { %v2060_v2 = vmul.f32 %v2028_v5, %v4100_v47  ;;  %v1627_v42 = vadd.f32 %v1626_v56, %v4044_v16  ;;  %3254 = vpow2.f32 %v1853_v18  ;;  %v2025_v22 = vmul.f32 %v3249_v23, %v4121_v43 }
 0x258   :  { %v3251_v59 = vpop.eup %3250  ;;  %v1859_v13 = vmul.f32 1.442695, %v1810_v38  ;;  %v1677_v61 = vpop.f32.mrf.mxu3  ;;  %v4149_v29 = vmul.f32 %v3247_v21, %v1901_v31 }
 0x259   :  { %v1904_v62 = vadd.f32 2.0, %v3251_v59  ;;  %v1726_v6 = vpop.f32.mrf.mxu0  ;;  %v4151_v35 = vadd.f32 %v1675_v0, %v1627_v42  ;;  %v2086_v11 = vpack.c.bf16 %v2060_v2, %v2058_v17  ;;  %v2057_v48 = vmul.f32 %v2025_v22, %v4096_v7 }
 0x25a   :  { %3256 = vpow2.f32 %v1859_v13  ;;  %v1727_v46 = vadd.f32 %v1726_v6, %v4030_v54  ;;  %v1778_v41 = vpop.f32.mrf.mxu1  ;;  %v3253_v63 = vpop.eup %3252  ;;  %v1965_v44 = vadd.f32 2.0, %v4149_v29 }
 0x25b   :  { %3258 = vrcp.f32 %v1966_v53  ;;  %v1936_v47 = vmul.f32 %v3251_v59, %v1904_v62  ;;  %v1809_v60 = vmin.f32 %v4151_v35, 20.0  ;;  %2296 = vmatmul.bf16.gmra.mxu3 %v2086_v11  ;;  %v2027_v49 = vmul.f32 %v3253_v63, %v1931_v4 }
 0x25c   :  { %v4156_v37 = vadd.f32 %v1775_v12, %v1727_v46 }
 0x25d   :  { %v1968_v1 = vadd.f32 2.0, %v1936_v47  ;;  %v1857_v34 = vmul.f32 1.442695, %v1809_v60  ;;  %v3255_v10 = vpop.eup %3254  ;;  %v2059_v43 = vmul.f32 %v2027_v49, %v4110_v3 }
 0x25e   :  { %v1812_v58 = vmin.f32 %v4156_v37, 20.0  ;;  %v1628_v52 = vpop.f32.mrf.mxu2  ;;  %v1903_v8 = vadd.f32 2.0, %v3255_v10 }
 0x25f   :  { %3260 = vrcp.f32 %v1968_v1  ;;  %v1629_v0 = vadd.f32 %v1628_v52, %v4044_v16  ;;  %v2085_v36 = vpack.c.bf16 %v2059_v43, %v2057_v48 }
 0x260   :  { %v3257_v32 = vpop.eup %3256  ;;  %3262 = vpow2.f32 %v1857_v34  ;;  %v1863_v27 = vmul.f32 1.442695, %v1812_v58  ;;  %v1680_v51 = vpop.f32.mrf.mxu3  ;;  %v1935_v40 = vmul.f32 %v3255_v10, %v1903_v8 }
 0x261   :  { %v3259_v33 = vpop.eup %3258  ;;  %3264 = vrcp.f32 %v1965_v44  ;;  %v1906_v19 = vadd.f32 2.0, %v3257_v32  ;;  %v1729_v50 = vpop.f32.mrf.mxu0  ;;  %v4166_v3 = vadd.f32 %v1677_v61, %v1629_v0  ;;  %2247 = vmatmul.bf16.gmra.mxu2 %v2085_v36 }
 0x262   :  { %3266 = vpow2.f32 %v1863_v27  ;;  %v1730_v7 = vadd.f32 %v1729_v50, %v4030_v54  ;;  %v1780_v45 = vpop.f32.mrf.mxu1  ;;  %v2030_v4 = vmul.f32 %v3259_v33, %v4136_v28  ;;  %v1967_v9 = vadd.f32 2.0, %v1935_v40 }
 0x263   :  { %v4164_v55 = vmul.f32 %v3257_v32, %v1906_v19  ;;  %v1811_v25 = vmin.f32 %v4166_v3, 20.0 }
 0x264   :  { %v4169_v12 = vadd.f32 %v1778_v41, %v1730_v7  ;;  %3268 = vrcp.f32 %v1967_v9  ;;  %v2062_v28 = vmul.f32 %v2030_v4, %v4113_v20 }
 0x265   :  { %v3261_v26 = vpop.eup %3260  ;;  %v1970_v38 = vadd.f32 2.0, %v4164_v55  ;;  %v1861_v53 = vmul.f32 1.442695, %v1811_v25 }
 0x266   :  { %v3263_v57 = vpop.eup %3262  ;;  %v2032_v14 = vmul.f32 %v3261_v26, %v1936_v47  ;;  %v1814_v21 = vmin.f32 %v4169_v12, 20.0  ;;  %v1631_v31 = vpop.f32.mrf.mxu2 }
 0x267   :  { %v3265_v5 = vpop.eup %3264  ;;  %v1905_v23 = vadd.f32 2.0, %v3263_v57  ;;  %v1632_v17 = vadd.f32 %v1631_v31, %v4044_v16  ;;  %3270 = vpow2.f32 %v1861_v53 }
 0x268   :  { %v3267_v18 = vpop.eup %3266  ;;  %v2064_v56 = vmul.f32 %v2032_v14, %v4128_v24  ;;  %v1867_v59 = vmul.f32 1.442695, %v1814_v21  ;;  %v1682_v62 = vpop.f32.mrf.mxu3  ;;  %v2029_v41 = vmul.f32 %v3265_v5, %v4149_v29 }
 0x269   :  { %v4177_v2 = vmul.f32 %v3263_v57, %v1905_v23  ;;  %v1908_v13 = vadd.f32 2.0, %v3267_v18  ;;  %v1731_v42 = vpop.f32.mrf.mxu0  ;;  %v4179_v61 = vadd.f32 %v1680_v51, %v1632_v17 }
 0x26a   :  { %3272 = vpow2.f32 %v1867_v59  ;;  %v1732_v6 = vadd.f32 %v1731_v42, %v4030_v54  ;;  %v2088_v46 = vpack.c.bf16 %v2064_v56, %v2062_v28  ;;  %v3269_v24 = vpop.eup %3268  ;;  %v1783_v49 = vpop.f32.mrf.mxu1  ;;  %v2061_v58 = vmul.f32 %v2029_v41, %v4123_v39 }
 0x26b   :  { %3274 = vrcp.f32 %v1970_v38  ;;  %v1940_v20 = vmul.f32 %v3267_v18, %v1908_v13  ;;  %v1813_v11 = vmin.f32 %v4179_v61, 20.0  ;;  %v2031_v47 = vmul.f32 %v3269_v24, %v1935_v40 }
 0x26c   :  { %v4184_v22 = vadd.f32 %v1780_v45, %v1732_v6  ;;  %2301 = vmatmul.bf16.gmra.mxu3 %v2088_v46  ;;  %v1969_v63 = vadd.f32 2.0, %v4177_v2 }
 0x26d   :  { %v1972_v60 = vadd.f32 2.0, %v1940_v20  ;;  %v1865_v44 = vmul.f32 1.442695, %v1813_v11  ;;  %v3271_v34 = vpop.eup %3270  ;;  %v2063_v29 = vmul.f32 %v2031_v47, %v4138_v30 }
 0x26e   :  { %v1816_v1 = vmin.f32 %v4184_v22, 20.0  ;;  %v1633_v10 = vpop.f32.mrf.mxu2  ;;  %v1907_v43 = vadd.f32 2.0, %v3271_v34 }
 0x26f   :  { %3276 = vrcp.f32 %v1972_v60  ;;  %v1634_v27 = vadd.f32 %v1633_v10, %v4044_v16  ;;  %v2087_v33 = vpack.c.bf16 %v2063_v29, %v2061_v58 }
 0x270   :  { %v3273_v48 = vpop.eup %3272  ;;  %3278 = vpow2.f32 %v1865_v44  ;;  %v1871_v52 = vmul.f32 1.442695, %v1816_v1  ;;  %v1939_v19 = vmul.f32 %v3271_v34, %v1907_v43  ;;  %v1685_v40 = vpop.f32.mrf.mxu3 }
 0x271   :  { %v3275_v32 = vpop.eup %3274  ;;  %3280 = vrcp.f32 %v1969_v63  ;;  %v1910_v8 = vadd.f32 2.0, %v3273_v48  ;;  %v1734_v51 = vpop.f32.mrf.mxu0  ;;  %v4194_v30 = vadd.f32 %v1682_v62, %v1634_v27  ;;  %2252 = vmatmul.bf16.gmra.mxu2 %v2087_v33 }
 0x272   :  { %3282 = vpow2.f32 %v1871_v52  ;;  %v1735_v0 = vadd.f32 %v1734_v51, %v4030_v54  ;;  %v2034_v50 = vmul.f32 %v3275_v32, %v4164_v55  ;;  %v1971_v36 = vadd.f32 2.0, %v1939_v19  ;;  %v1785_v38 = vpop.f32.mrf.mxu1 }
 0x273   :  { %v4192_v39 = vmul.f32 %v3273_v48, %v1910_v8  ;;  %v1815_v4 = vmin.f32 %v4194_v30, 20.0 }
 0x274   :  { %v4197_v7 = vadd.f32 %v1783_v49, %v1735_v0  ;;  %3284 = vrcp.f32 %v1971_v36  ;;  %v2066_v53 = vmul.f32 %v2034_v50, %v4141_v15 }
 0x275   :  { %v3277_v45 = vpop.eup %3276  ;;  %v1974_v14 = vadd.f32 2.0, %v4192_v39  ;;  %v1869_v5 = vmul.f32 1.442695, %v1815_v4 }
 0x276   :  { %v3279_v9 = vpop.eup %3278  ;;  %v2036_v26 = vmul.f32 %v3277_v45, %v1940_v20  ;;  %v1818_v25 = vmin.f32 %v4197_v7, 20.0  ;;  %v1636_v23 = vpop.f32.mrf.mxu2 }
 0x277   :  { %v3281_v57 = vpop.eup %3280  ;;  %v1909_v21 = vadd.f32 2.0, %v3279_v9  ;;  %v1637_v28 = vadd.f32 %v1636_v23, %v4044_v16  ;;  %3286 = vpow2.f32 %v1869_v5 }
 0x278   :  { %v3283_v55 = vpop.eup %3282  ;;  %v2068_v31 = vmul.f32 %v2036_v26, %v4156_v37  ;;  %v1875_v18 = vmul.f32 1.442695, %v1818_v25  ;;  %v2033_v6 = vmul.f32 %v3281_v57, %v4177_v2  ;;  %v1687_v63 = vpop.f32.mrf.mxu3 }
 0x279   :  { %v4205_v56 = vmul.f32 %v3279_v9, %v1909_v21  ;;  %v1912_v59 = vadd.f32 2.0, %v3283_v55  ;;  %v1736_v17 = vpop.f32.mrf.mxu0  ;;  %v4207_v13 = vadd.f32 %v1685_v40, %v1637_v28 }
 0x27a   :  { %3288 = vpow2.f32 %v1875_v18  ;;  %v1737_v42 = vadd.f32 %v1736_v17, %v4030_v54  ;;  %v2090_v62 = vpack.c.bf16 %v2068_v31, %v2066_v53  ;;  %v3285_v46 = vpop.eup %3284  ;;  %v2065_v44 = vmul.f32 %v2033_v6, %v4151_v35  ;;  %v1788_v43 = vpop.f32.mrf.mxu1 }
 0x27b   :  { %3290 = vrcp.f32 %v1974_v14  ;;  %v1944_v15 = vmul.f32 %v3283_v55, %v1912_v59  ;;  %v1817_v37 = vmin.f32 %v4207_v13, 20.0  ;;  %v2035_v20 = vmul.f32 %v3285_v46, %v1939_v19 }
 0x27c   :  { %v4212_v41 = vadd.f32 %v1785_v38, %v1737_v42  ;;  %2306 = vmatmul.bf16.gmra.mxu3 %v2090_v62  ;;  %v1973_v24 = vadd.f32 2.0, %v4205_v56 }
 0x27d   :  { %v1976_v11 = vadd.f32 2.0, %v1944_v15  ;;  %v1873_v47 = vmul.f32 1.442695, %v1817_v37  ;;  %v3287_v49 = vpop.eup %3286  ;;  %v2067_v2 = vmul.f32 %v2035_v20, %v4166_v3 }
 0x27e   :  { %v1820_v60 = vmin.f32 %v4212_v41, 20.0  ;;  %v1638_v1 = vpop.f32.mrf.mxu2  ;;  %v1911_v58 = vadd.f32 2.0, %v3287_v49 }
 0x27f   :  { %3292 = vrcp.f32 %v1976_v11  ;;  %v1639_v52 = vadd.f32 %v1638_v1, %v4044_v16  ;;  %v2089_v8 = vpack.c.bf16 %v2067_v2, %v2065_v44 }
 0x280   :  { %v3289_v34 = vpop.eup %3288  ;;  %3294 = vpow2.f32 %v1873_v47  ;;  %v1879_v29 = vmul.f32 1.442695, %v1820_v60  ;;  %v1943_v27 = vmul.f32 %v3287_v49, %v1911_v58  ;;  %v1690_v38 = vpop.f32.mrf.mxu3 }
 0x281   :  { %v3291_v10 = vpop.eup %3290  ;;  %3296 = vrcp.f32 %v1973_v24  ;;  %v1914_v48 = vadd.f32 2.0, %v3289_v34  ;;  %v1739_v32 = vpop.f32.mrf.mxu0  ;;  %v4222_v3 = vadd.f32 %v1687_v63, %v1639_v52  ;;  %2257 = vmatmul.bf16.gmra.mxu2 %v2089_v8 }
 0x282   :  { %3298 = vpow2.f32 %v1879_v29  ;;  %v1740_v35 = vadd.f32 %v1739_v32, %v4030_v54  ;;  %v2038_v33 = vmul.f32 %v3291_v10, %v4192_v39  ;;  %v1975_v19 = vadd.f32 2.0, %v1943_v27  ;;  %v1790_v62 = vpop.f32.mrf.mxu1 }
 0x283   :  { %v4220_v51 = vmul.f32 %v3289_v34, %v1914_v48  ;;  %v1819_v36 = vmin.f32 %v4222_v3, 20.0 }
 0x284   :  { %v4225_v0 = vadd.f32 %v1788_v43, %v1740_v35  ;;  %3300 = vrcp.f32 %v1975_v19  ;;  %v2070_v39 = vmul.f32 %v2038_v33, %v4169_v12 }
 0x285   :  { %v3293_v50 = vpop.eup %3292  ;;  %v1978_v26 = vadd.f32 2.0, %v4220_v51  ;;  %v1877_v57 = vmul.f32 1.442695, %v1819_v36 }
 0x286   :  { %v3295_v40 = vpop.eup %3294  ;;  %v2040_v45 = vmul.f32 %v3293_v50, %v1944_v15  ;;  %v1822_v4 = vmin.f32 %v4225_v0, 20.0  ;;  %v1641_v14 = vpop.f32.mrf.mxu2 }
 0x287   :  { %v3297_v9 = vpop.eup %3296  ;;  %v1913_v25 = vadd.f32 2.0, %v3295_v40  ;;  %v1642_v55 = vadd.f32 %v1641_v14, %v4044_v16  ;;  %3302 = vpow2.f32 %v1877_v57 }
 0x288   :  { %v3299_v21 = vpop.eup %3298  ;;  %v2072_v5 = vmul.f32 %v2040_v45, %v4184_v22  ;;  %v1883_v23 = vmul.f32 1.442695, %v1822_v4  ;;  %v2037_v42 = vmul.f32 %v3297_v9, %v4205_v56  ;;  %v1692_v10 = vpop.f32.mrf.mxu3 }
 0x289   :  { %v1945_v53 = vmul.f32 %v3295_v40, %v1913_v25  ;;  %v1916_v31 = vadd.f32 2.0, %v3299_v21  ;;  %v1741_v18 = vpop.f32.mrf.mxu0  ;;  %v4233_v28 = vadd.f32 %v1690_v38, %v1642_v55 }
 0x28a   :  { %3304 = vpow2.f32 %v1883_v23  ;;  %v1742_v59 = vadd.f32 %v1741_v18, %v4030_v54  ;;  %v2092_v17 = vpack.c.bf16 %v2072_v5, %v2070_v39  ;;  %v3301_v22 = vpop.eup %3300  ;;  %v2069_v54 = vmul.f32 %v2037_v42, %v4179_v61 }
 0x28b   :  { %3306 = vrcp.f32 %v1978_v26  ;;  %v1948_v12 = vmul.f32 %v3299_v21, %v1916_v31  ;;  %v1821_v6 = vmin.f32 %v4233_v28, 20.0  ;;  %v2039_v46 = vmul.f32 %v3301_v22, %v1943_v27 }
 0x28c   :  { %v4238_v15 = vadd.f32 %v1790_v62, %v1742_v59  ;;  %2311 = vmatmul.bf16.gmra.mxu3 %v2092_v17  ;;  %v1977_v37 = vadd.f32 2.0, %v1945_v53 }
 0x28d   :  { %v1980_v20 = vadd.f32 2.0, %v1948_v12  ;;  %v1881_v24 = vmul.f32 1.442695, %v1821_v6  ;;  %v3303_v47 = vpop.eup %3302  ;;  %v2071_v56 = vmul.f32 %v2039_v46, %v4194_v30 }
 0x28e   :  { %v1824_v11 = vmin.f32 %v4238_v15, 20.0  ;;  %v1643_v63 = vpop.f32.mrf.mxu2  ;;  %v1915_v49 = vadd.f32 2.0, %v3303_v47 }
 0x28f   :  { %3308 = vrcp.f32 %v1980_v20  ;;  %v1644_v34 = vadd.f32 %v1643_v63, %v4044_v16  ;;  %v2091_v58 = vpack.c.bf16 %v2071_v56, %v2069_v54 }
 0x290   :  { %v3305_v60 = vpop.eup %3304  ;;  %3310 = vpow2.f32 %v1881_v24  ;;  %v1887_v44 = vmul.f32 1.442695, %v1824_v11  ;;  %v1947_v29 = vmul.f32 %v3303_v47, %v1915_v49  ;;  %v4252_v47 = vld [vmem:[#allocation12] ss:$0 sm:$0xff] }
 0x291   :  { %v3307_v2 = vpop.eup %3306  ;;  %3312 = vrcp.f32 %v1977_v37  ;;  %v1918_v1 = vadd.f32 2.0, %v3305_v60  ;;  %v1693_v43 = vadd.f32 %v1692_v10, %v1644_v34  ;;  %2262 = vmatmul.bf16.gmra.mxu2 %v2091_v58 }
 0x292   :  { %3314 = vpow2.f32 %v1887_v44  ;;  %v2042_v61 = vmul.f32 %v3307_v2, %v4220_v51  ;;  %v1979_v30 = vadd.f32 2.0, %v1947_v29 }
 0x293   :  { %v1950_v48 = vmul.f32 %v3305_v60, %v1918_v1  ;;  %v1823_v32 = vmin.f32 %v1693_v43, 20.0 }
 0x294   :  { %3316 = vrcp.f32 %v1979_v30  ;;  %v2074_v36 = vmul.f32 %v2042_v61, %v4197_v7 }
 0x295   :  { %v3309_v52 = vpop.eup %3308  ;;  %v1982_v33 = vadd.f32 2.0, %v1950_v48  ;;  %v1885_v50 = vmul.f32 1.442695, %v1823_v32 }
 0x296   :  { %v3311_v8 = vpop.eup %3310  ;;  %v2044_v27 = vmul.f32 %v3309_v52, %v1948_v12 }
 0x297   :  { %v3313_v35 = vpop.eup %3312  ;;  %v1917_v19 = vadd.f32 2.0, %v3311_v8  ;;  %3318 = vpow2.f32 %v1885_v50 }
 0x298   :  { %v3315_v16 = vpop.eup %3314  ;;  %v2076_v40 = vmul.f32 %v2044_v27, %v4212_v41  ;;  %v2041_v51 = vmul.f32 %v3313_v35, %v1945_v53  ;;  %3320 = vrcp.f32 %v1982_v33 }
 0x299   :  { %v1920_v45 = vadd.f32 2.0, %v3315_v16  ;;  %v1949_v4 = vmul.f32 %v3311_v8, %v1917_v19 }
 0x29a   :  { %v2094_v9 = vpack.c.bf16 %v2076_v40, %v2074_v36  ;;  %v3317_v25 = vpop.eup %3316  ;;  %v2073_v5 = vmul.f32 %v2041_v51, %v4207_v13 }
 0x29b   :  { %v1952_v26 = vmul.f32 %v3315_v16, %v1920_v45  ;;  %v2043_v57 = vmul.f32 %v3317_v25, %v1947_v29  ;;  %v1981_v21 = vadd.f32 2.0, %v1949_v4 }
 0x29c   :  { %2316 = vmatmul.bf16.gmra.mxu3 %v2094_v9 }
 0x29d   :  { %v1984_v14 = vadd.f32 2.0, %v1952_v26  ;;  %v3319_v39 = vpop.eup %3318  ;;  %v2075_v38 = vmul.f32 %v2043_v57, %v4222_v3 }
 0x29e   :  { %v1919_v7 = vadd.f32 2.0, %v3319_v39  ;;  %v3321_v41 = vpop.eup %3320 }
 0x29f   :  { %3322 = vrcp.f32 %v1984_v14  ;;  %v2093_v23 = vpack.c.bf16 %v2075_v38, %v2073_v5  ;;  %v2046_v53 = vmul.f32 %v3321_v41, %v1950_v48 }
 0x2a0   :  { %3324 = vrcp.f32 %v1981_v21  ;;  %v1951_v55 = vmul.f32 %v3319_v39, %v1919_v7 }
 0x2a1   :  { %2267 = vmatmul.bf16.gmra.mxu2 %v2093_v23  ;;  %v2078_v42 = vmul.f32 %v2046_v53, %v4225_v0 }
 0x2a2   :  { %v1983_v31 = vadd.f32 2.0, %v1951_v55 }
 0x2a4   :  { %3326 = vrcp.f32 %v1983_v31 }
 0x2a5   :  { %v3323_v18 = vpop.eup %3322 }
 0x2a6   :  { %v2048_v59 = vmul.f32 %v3323_v18, %v1952_v26  ;;  %v3325_v17 = vpop.eup %3324 }
 0x2a7   :  { %v2045_v62 = vmul.f32 %v3325_v17, %v1949_v4 }
 0x2a8   :  { %v2080_v12 = vmul.f32 %v2048_v59, %v4238_v15 }
 0x2a9   :  { %v2077_v6 = vmul.f32 %v2045_v62, %v4233_v28 }
 0x2aa   :  { %v2096_v13 = vpack.c.bf16 %v2080_v12, %v2078_v42  ;;  %v3327_v3 = vpop.eup %3326 }
 0x2ab   :  { %v2047_v22 = vmul.f32 %v3327_v3, %v1951_v55 }
 0x2ac   :  { %2321 = vmatmul.bf16.gmra.mxu3 %v2096_v13 }
 0x2ad   :  { %v2079_v46 = vmul.f32 %v2047_v22, %v1693_v43 }
 0x2af   :  { %v2095_v37 = vpack.c.bf16 %v2079_v46, %v2077_v6 }
 0x2b1   :  { %2272 = vmatmul.bf16.gmra.mxu2 %v2095_v37 }
 0x2be   :  { %v2287_v20 = vpop.f32.mrf.mxu3 }
 0x2c4   :  { %v2238_v24 = vpop.f32.mrf.mxu2 }
 0x2c5   :  { %v2239_v54 = vadd.f32 %v4252_v47, %v2238_v24 }
 0x2c6   :  { %v2289_v11 = vpop.f32.mrf.mxu3 }
 0x2c7   :  { %v2288_v63 = vadd.f32 %v2287_v20, %v2239_v54 }
 0x2cc   :  { %v2240_v0 = vpop.f32.mrf.mxu2 }
 0x2cd   :  { %v2241_v15 = vadd.f32 %v4252_v47, %v2240_v0 }
 0x2ce   :  { %v2292_v56 = vpop.f32.mrf.mxu3 }
 0x2cf   :  { %v2290_v60 = vadd.f32 %v2289_v11, %v2241_v15 }
 0x2d1   :  { %v2890_v49 = vpack.c.bf16 %v2290_v60, %v2288_v63 }
 0x2d3   :  { %2891 = vst [vmem:[%s4303_s9] sm:$0xff] %v2890_v49  }
 0x2d4   :  { %v2243_v28 = vpop.f32.mrf.mxu2 }
 0x2d5   :  { %v2244_v2 = vadd.f32 %v4252_v47, %v2243_v28 }
 0x2d6   :  { %v2294_v44 = vpop.f32.mrf.mxu3 }
 0x2d7   :  { %v2293_v29 = vadd.f32 %v2292_v56, %v2244_v2 }
 0x2dc   :  { %v2245_v1 = vpop.f32.mrf.mxu2 }
 0x2dd   :  { %v2246_v34 = vadd.f32 %v4252_v47, %v2245_v1 }
 0x2de   :  { %v2297_v58 = vpop.f32.mrf.mxu3 }
 0x2df   :  { %v2295_v10 = vadd.f32 %v2294_v44, %v2246_v34 }
 0x2e1   :  { %v2895_v48 = vpack.c.bf16 %v2295_v10, %v2293_v29 }
 0x2e3   :  { %2927 = vst [vmem:[%s4303_s9 + $0x8] sm:$0xff] %v2895_v48  }
 0x2e4   :  { %v2248_v43 = vpop.f32.mrf.mxu2 }
 0x2e5   :  { %v2249_v30 = vadd.f32 %v4252_v47, %v2248_v43 }
 0x2e6   :  { %v2299_v61 = vpop.f32.mrf.mxu3 }
 0x2e7   :  { %v2298_v27 = vadd.f32 %v2297_v58, %v2249_v30 }
 0x2ec   :  { %v2250_v52 = vpop.f32.mrf.mxu2 }
 0x2ed   :  { %v2251_v32 = vadd.f32 %v4252_v47, %v2250_v52 }
 0x2ef   :  { %v2302_v8 = vpop.f32.mrf.mxu3  ;;  %v2300_v35 = vadd.f32 %v2299_v61, %v2251_v32 }
 0x2f1   :  { %v2900_v33 = vpack.c.bf16 %v2300_v35, %v2298_v27 }
 0x2f3   :  { %2928 = vst [vmem:[%s4303_s9 + $0x10] sm:$0xff] %v2900_v33  }
 0x2f4   :  { %v2253_v19 = vpop.f32.mrf.mxu2 }
 0x2f5   :  { %v2254_v16 = vadd.f32 %v4252_v47, %v2253_v19 }
 0x2f7   :  { %v2304_v50 = vpop.f32.mrf.mxu3  ;;  %v2303_v4 = vadd.f32 %v2302_v8, %v2254_v16 }
 0x2fc   :  { %v2255_v36 = vpop.f32.mrf.mxu2 }
 0x2fd   :  { %v2256_v40 = vadd.f32 %v4252_v47, %v2255_v36 }
 0x2ff   :  { %v2307_v45 = vpop.f32.mrf.mxu3  ;;  %v2305_v9 = vadd.f32 %v2304_v50, %v2256_v40 }
 0x301   :  { %v2905_v51 = vpack.c.bf16 %v2305_v9, %v2303_v4 }
 0x303   :  { %2929 = vst [vmem:[%s4303_s9 + $0x18] sm:$0xff] %v2905_v51  }
 0x304   :  { %v2258_v26 = vpop.f32.mrf.mxu2 }
 0x305   :  { %v2259_v57 = vadd.f32 %v4252_v47, %v2258_v26 }
 0x307   :  { %v2309_v25 = vpop.f32.mrf.mxu3  ;;  %v2308_v5 = vadd.f32 %v2307_v45, %v2259_v57 }
 0x30c   :  { %v2260_v14 = vpop.f32.mrf.mxu2 }
 0x30d   :  { %v2261_v21 = vadd.f32 %v4252_v47, %v2260_v14 }
 0x30f   :  { %v2312_v39 = vpop.f32.mrf.mxu3  ;;  %v2310_v38 = vadd.f32 %v2309_v25, %v2261_v21 }
 0x311   :  { %v2910_v7 = vpack.c.bf16 %v2310_v38, %v2308_v5 }
 0x313   :  { %2930 = vst [vmem:[%s4303_s9 + $0x20] sm:$0xff] %v2910_v7  }
 0x314   :  { %v2263_v41 = vpop.f32.mrf.mxu2 }
 0x315   :  { %v2264_v55 = vadd.f32 %v4252_v47, %v2263_v41 }
 0x317   :  { %v2314_v23 = vpop.f32.mrf.mxu3  ;;  %v2313_v18 = vadd.f32 %v2312_v39, %v2264_v55 }
 0x31c   :  { %v2265_v53 = vpop.f32.mrf.mxu2 }
 0x31d   :  { %v2266_v31 = vadd.f32 %v4252_v47, %v2265_v53 }
 0x31f   :  { %v2315_v59 = vadd.f32 %v2314_v23, %v2266_v31  ;;  %v2317_v17 = vpop.f32.mrf.mxu3 }
 0x321   :  { %v2915_v42 = vpack.c.bf16 %v2315_v59, %v2313_v18 }
 0x323   :  { %2931 = vst [vmem:[%s4303_s9 + $0x28] sm:$0xff] %v2915_v42  }
 0x324   :  { %v2268_v12 = vpop.f32.mrf.mxu2 }
 0x325   :  { %v2269_v62 = vadd.f32 %v4252_v47, %v2268_v12 }
 0x327   :  { %v2319_v13 = vpop.f32.mrf.mxu3  ;;  %v2318_v6 = vadd.f32 %v2317_v17, %v2269_v62 }
 0x32c   :  { %v2270_v3 = vpop.f32.mrf.mxu2 }
 0x32d   :  { %v2271_v22 = vadd.f32 %v4252_v47, %v2270_v3 }
 0x32f   :  { %v2320_v46 = vadd.f32 %v2319_v13, %v2271_v22  ;;  %v2322_v20 = vpop.f32.mrf.mxu3 }
 0x331   :  { %v2920_v37 = vpack.c.bf16 %v2320_v46, %v2318_v6 }
 0x333   :  { %2932 = vst [vmem:[%s4303_s9 + $0x30] sm:$0xff] %v2920_v37  }
 0x334   :  { %v2273_v24 = vpop.f32.mrf.mxu2 }
 0x335   :  { %v2274_v11 = vadd.f32 %v4252_v47, %v2273_v24 }
 0x337   :  { %v2324_v15 = vpop.f32.mrf.mxu3  ;;  %v2323_v56 = vadd.f32 %v2322_v20, %v2274_v11 }
 0x33c   :  { %v2275_v54 = vpop.f32.mrf.mxu2 }
 0x33d   :  { %v2276_v0 = vadd.f32 %v4252_v47, %v2275_v54 }
 0x33f   :  { %v2325_v63 = vadd.f32 %v2324_v15, %v2276_v0 }
 0x341   :  { %v2925_v60 = vpack.c.bf16 %v2325_v63, %v2323_v56 }
 0x343   :  { %2933 = vst [vmem:[%s4303_s9 + $0x38] sm:$0xff] %v2925_v60  }
 0x344   :  { %2363 = vsyncpa [#allocation3], 1 }
 0x345   :  { %2364 = vsyncpa [#allocation5], 1 }
 0x346   :  { %2365 = vsyncpa [#allocation8], 1 }
 0x347   :  { %2366 = vsyncpa [#allocation11], 1 }

</bundles_post_ra>
